<compile_context>
chip_gen: v7x
topology: tpu7x:2x2x1
jax: 0.10.0
libtpu: 0.0.40
codegen_flags: <defaults>
</compile_context>

<pallas_src>
import math
import numpy as np

import jax
import jax.numpy as jnp
from jax.experimental import pallas as pl
from jax.experimental.pallas import tpu as pltpu


# ----------------------------------------------------------------------------
# Config (fields `forward` reads from cfg)
# ----------------------------------------------------------------------------
class Cfg:
    emb_dim = 32
    latent_dim = 32
    center_pc = True
    pretrain = None
    use_intent = False
    use_language = True          # forward asserts this
    block_computing = True       # handled by the Pallas grid tiling


# ----------------------------------------------------------------------------
# Pallas kernel: pairwise MLPKernel over all (i, j) point pairs.
#
#   dro[b, m, n] = sum_h w2[h] * relu( a_proj[b, m, h] + b_proj_t[b, h, n] ) + b2
#
# with a_proj / b_proj_t precomputed outside (concat-split of the first Linear).
# ----------------------------------------------------------------------------
def _dro_pair_kernel(w2_ref, b2_ref,                  # scalar prefetch (SMEM)
                     a4_ref, bt_ref, out_ref):
    """a4_ref : (1, C, TM, HC) f32 — a_proj tile with H pre-chunked (C*HC = H);
                per-chunk access is a plain leading-dim index, and the static
                per-h columns are the lane-broadcast sources.
       bt_ref : (1, H, TN) f32 — b_proj^T tile, H on sublanes, TN lane-dense.
       out_ref: (1, TM, TN) f32.
    """
    n_chunks = a4_ref.shape[1]
    tm = a4_ref.shape[2]
    hc = a4_ref.shape[3]
    tn = bt_ref.shape[2]
    ls = min(tn, 128)                  # lane sub-tile: accumulator stays (tm, 128)
    n_sub = tn // ls

    b2 = b2_ref[0]

    for s in range(n_sub):                             # static; 1..4 iterations
        col = s * ls

        def chunk_body(c, acc):
            h0 = pl.multiple_of(c * hc, hc)
            a_slab = a4_ref[0, c]                               # (tm, hc)
            b_slab = bt_ref[0, pl.ds(h0, hc), pl.ds(col, ls)]   # (hc, ls)
            for hh in range(hc):                       # static unroll -> VPU ILP
                a_col = jnp.broadcast_to(a_slab[:, hh:hh + 1], (tm, ls))  # lane bcast
                b_row = jnp.broadcast_to(b_slab[hh:hh + 1, :], (tm, ls))  # sublane bcast
                acc = acc + w2_ref[h0 + hh] * jnp.maximum(a_col + b_row, 0.0)
            return acc

        acc = jax.lax.fori_loop(0, n_chunks, chunk_body,
                                jnp.full((tm, ls), b2, jnp.float32))
        out_ref[0, :, pl.ds(col, ls)] = acc


def mlp_kernel_pairwise(phi_a, phi_b, kparams, *, tm=128, tn=256, h_chunk=8):
    """phi_a, phi_b: (B, N, D) float32.  Returns dro: (B, N, N) float32."""
    B, N, D = phi_a.shape
    tm = min(tm, N)
    tn = min(tn, N)
    assert N % tm == 0 and N % tn == 0, "tile sizes must divide N"
    assert tn % 128 == 0 or tn == N, "keep output stores lane-dense"
    H = kparams["w1"].shape[1]
    assert H % h_chunk == 0
    n_chunks = H // h_chunk

    w1 = kparams["w1"].astype(jnp.float32)                  # (2D, H)
    b1 = kparams["b1"].astype(jnp.float32)                  # (H,)
    w2 = kparams["w2"].reshape(H).astype(jnp.float32)       # SMEM scalars
    b2 = kparams["b2"].reshape(1).astype(jnp.float32)       # SMEM scalar

    # Hoisted projections (plain XLA matmuls).  [a ; b] @ W1 = a@W1[:D] + b@W1[D:];
    # D == H, so the HBM bytes the Pallas kernel reads are unchanged, but the
    # per-tile MXU dots (and their redundant recompute across the innermost grid
    # axis) disappear — the kernel keeps only the O(B*N^2*H) element-wise work.
    a_proj = jnp.einsum("bnd,dh->bnh", phi_a, w1[:D]) + b1          # (B, N, H)
    b_projt = jnp.einsum("bnd,dh->bhn", phi_b, w1[D:])              # (B, H, N)
    # Pre-chunk a_proj along H: the kernel's per-chunk access is then a plain
    # dynamic index on a leading block dim (cheap address math, no dynamic
    # lane slices, no in-kernel transpose).  Each (tm, h_chunk) slab is a
    # contiguous 4 KiB HBM run, so the DMA stays chunky.
    a4 = a_proj.reshape(B, N, n_chunks, h_chunk).transpose(0, 2, 1, 3)  # (B,C,N,HC)

    grid = (B, N // tm, N // tn)
    flops = 4 * B * N * N * H                       # add / relu / mul / acc per h
    bytes_accessed = 4 * (a4.size + b_projt.size + B * N * N)

    # Per-step VMEM (double-buffered): a4 ~2*512 KiB (minor dim 8 lane-pads),
    # bt ~2*64 KiB, out ~2*128 KiB  ->  < 1.5 MiB, fits every generation's
    # scoped default (16/32 MiB) incl. v7x's 64 MiB physical VMEM.
    return pl.pallas_call(
        _dro_pair_kernel,
        out_shape=jax.ShapeDtypeStruct((B, N, N), jnp.float32),
        grid_spec=pltpu.PrefetchScalarGridSpec(
            num_scalar_prefetch=2,                   # w2, b2 -> SMEM
            grid=grid,
            in_specs=[
                pl.BlockSpec((1, n_chunks, tm, h_chunk),
                             lambda b, i, j, w2r, b2r: (b, 0, i, 0)),
                pl.BlockSpec((1, H, tn),
                             lambda b, i, j, w2r, b2r: (b, 0, j)),
            ],
            out_specs=pl.BlockSpec((1, tm, tn),
                                   lambda b, i, j, w2r, b2r: (b, i, j)),
        ),
        compiler_params=pltpu.CompilerParams(
            dimension_semantics=("parallel", "parallel", "parallel")),
        cost_estimate=pl.CostEstimate(flops=int(flops), transcendentals=0,
                                      bytes_accessed=int(bytes_accessed)),
    )(w2, b2, a4, b_projt)


# ----------------------------------------------------------------------------
# Glue modules (plain JAX): encoders + cross-attention "Transformer"
# ----------------------------------------------------------------------------
def encoder_fwd(p, pc):
    # TODO(synk): reference uses create_encoder_network (DGCNN/PointNet-style);
    # simplified to a per-point MLP 3 -> 64 -> emb_dim.
    h = jnp.maximum(pc @ p["w0"] + p["b0"], 0.0)
    return h @ p["w1"] + p["b1"]                      # (B, N, emb_dim)


def transformer_fwd(p, src, tgt):
    # TODO(synk): reference Transformer is a DCP-style encoder/decoder
    # (n_blocks=2, ff_dims=2*D); here a single-head cross-attention block
    # on the same emb_dim+latent_dim width, producing 'src_embedding'.
    q = src @ p["wq"]
    k = tgt @ p["wk"]
    v = tgt @ p["wv"]
    scale = 1.0 / math.sqrt(q.shape[-1])
    attn = jax.nn.softmax(jnp.einsum("bqd,bkd->bqk", q, k) * scale, axis=-1)
    out = jnp.einsum("bqk,bkd->bqd", attn, v) @ p["wo"]
    return {"src_embedding": out}


# ----------------------------------------------------------------------------
# Parameter init (deterministic, synthetic)
# ----------------------------------------------------------------------------
def init_params(cfg, seed=0):
    key = jax.random.PRNGKey(seed)
    ks = jax.random.split(key, 16)
    e, hid = cfg.emb_dim, 64
    D = cfg.emb_dim + cfg.latent_dim                  # transformer / kernel width
    H = 64                                            # MLPKernel hidden width

    def n(k, shape, s=0.1):
        return (s * jax.random.normal(k, shape)).astype(jnp.float32)

    def enc(k0, k1):
        return {"w0": n(k0, (3, hid)), "b0": jnp.zeros((hid,), jnp.float32),
                "w1": n(k1, (hid, e)), "b1": jnp.zeros((e,), jnp.float32)}

    def tf(k0, k1, k2, k3):
        return {"wq": n(k0, (D, D)), "wk": n(k1, (D, D)),
                "wv": n(k2, (D, D)), "wo": n(k3, (D, D))}

    return {
        "enc_robot": enc(ks[0], ks[1]),
        "enc_object": enc(ks[2], ks[3]),
        "tf_robot": tf(ks[4], ks[5], ks[6], ks[7]),
        "tf_object": tf(ks[8], ks[9], ks[10], ks[11]),
        "kernel": {"w1": n(ks[12], (2 * D, H)),
                   "b1": n(ks[13], (H,)),
                   "w2": n(ks[14], (H,)),
                   "b2": n(ks[15], (1,))},
    }


# ----------------------------------------------------------------------------
# Network forward (use_language=True path, as asserted by the reference)
# ----------------------------------------------------------------------------
def network_forward(params, cfg, robot_pc, object_pc, language_emb):
    if cfg.center_pc:
        robot_pc = robot_pc - robot_pc.mean(axis=1, keepdims=True)

    robot_embedding = encoder_fwd(params["enc_robot"], robot_pc)
    object_embedding = encoder_fwd(params["enc_object"], object_pc)
    object_embedding = jax.lax.stop_gradient(object_embedding)   # .detach()

    # cfg.use_language -> z = language_emb; CVAE branch is dead code.
    z = language_emb
    mu, logvar = None, None

    B, N, _ = robot_embedding.shape
    z_rep = jnp.broadcast_to(z[:, None, :], (B, N, z.shape[-1]))
    robot_embedding_z = jnp.concatenate([robot_embedding, z_rep], axis=-1)
    object_embedding_z = jnp.concatenate([object_embedding, z_rep], axis=-1)

    tf_r = transformer_fwd(params["tf_robot"], robot_embedding_z, object_embedding_z)
    tf_o = transformer_fwd(params["tf_object"], object_embedding_z, robot_embedding_z)
    phi_a = robot_embedding_z + tf_r["src_embedding"]     # (B, N, D)
    phi_b = object_embedding_z + tf_o["src_embedding"]    # (B, N, D)

    dro = mlp_kernel_pairwise(phi_a, phi_b, params["kernel"])    # (B, N, N)
    return {"dro": dro, "mu": mu, "logvar": logvar,
            "phi_a": phi_a, "phi_b": phi_b}


# Pure-JAX reference of the pairwise MLPKernel (for correctness check)
def kernel_ref(phi_a, phi_b, kp):
    B, N, D = phi_a.shape
    A = jnp.broadcast_to(phi_a[:, :, None, :], (B, N, N, D))
    Bm = jnp.broadcast_to(phi_b[:, None, :, :], (B, N, N, D))
    x = jnp.concatenate([A, Bm], axis=-1)                        # (B, N, N, 2D)
    h = jnp.maximum(x @ kp["w1"] + kp["b1"], 0.0)
    return h @ kp["w2"] + kp["b2"][0]                            # (B, N, N)


# ----------------------------------------------------------------------------
if __name__ == "__main__":
    cfg = Cfg()
    B, N = 2, 128

    root = jax.random.PRNGKey(0)
    k_rpc, k_opc, k_lang = jax.random.split(root, 3)
    robot_pc = jax.random.normal(k_rpc, (B, N, 3), dtype=jnp.float32)
    object_pc = jax.random.normal(k_opc, (B, N, 3), dtype=jnp.float32)
    language_emb = jax.random.normal(k_lang, (B, cfg.latent_dim), dtype=jnp.float32)

    params = init_params(cfg, seed=0)

    outputs = network_forward(params, cfg, robot_pc, object_pc, language_emb)
    dro = jax.block_until_ready(outputs["dro"])
    assert dro.shape == (B, N, N)

    # Check the Pallas pairwise kernel against a pure-JAX reference on the
    # exact Phi_A / Phi_B it consumed.
    dro_ref = jax.block_until_ready(
        kernel_ref(outputs["phi_a"], outputs["phi_b"], params["kernel"]))
    np.testing.assert_allclose(np.asarray(dro), np.asarray(dro_ref),
                               rtol=2e-4, atol=2e-4)
    print("KERNEL_OK")
</pallas_src>

<mosaic_0001>
module attributes {stable_mosaic.version = 11 : i64} {
  func.func @_dro_pair_kernel(%arg0: i32, %arg1: i32, %arg2: i32, %arg3: memref<64xf32, #tpu.memory_space<smem>>, %arg4: memref<1xf32, #tpu.memory_space<smem>>, %arg5: memref<1x8x128x8xf32, #tpu.memory_space<vmem>>, %arg6: memref<1x64x128xf32, #tpu.memory_space<vmem>>, %arg7: memref<1x128x128xf32, #tpu.memory_space<vmem>>) attributes {dimension_semantics = [#tpu.dimension_semantics<parallel>, #tpu.dimension_semantics<parallel>, #tpu.dimension_semantics<parallel>], iteration_bounds = array<i64: 2, 1, 1>, scalar_prefetch = 2 : i64, scratch_operands = 0 : i64, tpu.core_type = #tpu.core_type<tc>, window_params = [{transform_indices = @transform_0, window_bounds = array<i64: 1, 8, 128, 8>}, {transform_indices = @transform_1, window_bounds = array<i64: 1, 64, 128>}, {transform_indices = @transform_2, window_bounds = array<i64: 1, 128, 128>}]} {
    %c0 = arith.constant 0 : index
    %0 = memref.load %arg4[%c0] : memref<1xf32, #tpu.memory_space<smem>>
    %1 = vector.broadcast %0 : f32 to vector<128x128xf32>
    %c0_i32 = arith.constant 0 : i32
    %c8_i32 = arith.constant 8 : i32
    %2 = arith.addi %c0_i32, %c8_i32 : i32
    %c1_i32 = arith.constant 1 : i32
    %3 = scf.for %arg8 = %c0_i32 to %2 step %c1_i32 iter_args(%arg9 = %1) -> (vector<128x128xf32>)  : i32 {
      %c8_i32_4 = arith.constant 8 : i32
      %7 = arith.muli %arg8, %c8_i32_4 : i32
      %8 = tpu.assume_multiple %7, 8 : i32
      %c0_5 = arith.constant 0 : index
      %9 = arith.index_cast %arg8 : i32 to index
      %c0_6 = arith.constant 0 : index
      %c0_7 = arith.constant 0 : index
      %10 = vector.load %arg5[%c0_5, %9, %c0_6, %c0_7] : memref<1x8x128x8xf32, #tpu.memory_space<vmem>>, vector<1x1x128x8xf32>
      %11 = vector.shape_cast %10 : vector<1x1x128x8xf32> to vector<128x8xf32>
      %c0_8 = arith.constant 0 : index
      %12 = arith.index_cast %8 : i32 to index
      %c0_9 = arith.constant 0 : index
      %13 = vector.load %arg6[%c0_8, %12, %c0_9] : memref<1x64x128xf32, #tpu.memory_space<vmem>>, vector<1x8x128xf32>
      %14 = vector.shape_cast %13 : vector<1x8x128xf32> to vector<8x128xf32>
      %15 = vector.extract_strided_slice %11 {offsets = [0, 0], sizes = [128, 1], strides = [1, 1]} : vector<128x8xf32> to vector<128x1xf32>
      %16 = vector.shape_cast %15 : vector<128x1xf32> to vector<128x1xf32>
      %17 = vector.broadcast %16 : vector<128x1xf32> to vector<128x128xf32>
      %18 = vector.extract_strided_slice %14 {offsets = [0, 0], sizes = [1, 128], strides = [1, 1]} : vector<8x128xf32> to vector<1x128xf32>
      %19 = vector.shape_cast %18 : vector<1x128xf32> to vector<1x128xf32>
      %20 = vector.broadcast %19 : vector<1x128xf32> to vector<128x128xf32>
      %c0_i32_10 = arith.constant 0 : i32
      %21 = arith.addi %8, %c0_i32_10 : i32
      %22 = arith.index_cast %21 : i32 to index
      %23 = memref.load %arg3[%22] : memref<64xf32, #tpu.memory_space<smem>>
      %24 = arith.addf %17, %20 : vector<128x128xf32>
      %cst = arith.constant 0.000000e+00 : f32
      %25 = vector.broadcast %cst : f32 to vector<128x128xf32>
      %26 = arith.maximumf %24, %25 : vector<128x128xf32>
      %27 = vector.broadcast %23 : f32 to vector<128x128xf32>
      %28 = arith.mulf %27, %26 : vector<128x128xf32>
      %29 = arith.addf %arg9, %28 : vector<128x128xf32>
      %30 = vector.extract_strided_slice %11 {offsets = [0, 1], sizes = [128, 1], strides = [1, 1]} : vector<128x8xf32> to vector<128x1xf32>
      %31 = vector.shape_cast %30 : vector<128x1xf32> to vector<128x1xf32>
      %32 = vector.broadcast %31 : vector<128x1xf32> to vector<128x128xf32>
      %33 = vector.extract_strided_slice %14 {offsets = [1, 0], sizes = [1, 128], strides = [1, 1]} : vector<8x128xf32> to vector<1x128xf32>
      %34 = vector.shape_cast %33 : vector<1x128xf32> to vector<1x128xf32>
      %35 = vector.broadcast %34 : vector<1x128xf32> to vector<128x128xf32>
      %c1_i32_11 = arith.constant 1 : i32
      %36 = arith.addi %8, %c1_i32_11 : i32
      %37 = arith.index_cast %36 : i32 to index
      %38 = memref.load %arg3[%37] : memref<64xf32, #tpu.memory_space<smem>>
      %39 = arith.addf %32, %35 : vector<128x128xf32>
      %cst_12 = arith.constant 0.000000e+00 : f32
      %40 = vector.broadcast %cst_12 : f32 to vector<128x128xf32>
      %41 = arith.maximumf %39, %40 : vector<128x128xf32>
      %42 = vector.broadcast %38 : f32 to vector<128x128xf32>
      %43 = arith.mulf %42, %41 : vector<128x128xf32>
      %44 = arith.addf %29, %43 : vector<128x128xf32>
      %45 = vector.extract_strided_slice %11 {offsets = [0, 2], sizes = [128, 1], strides = [1, 1]} : vector<128x8xf32> to vector<128x1xf32>
      %46 = vector.shape_cast %45 : vector<128x1xf32> to vector<128x1xf32>
      %47 = vector.broadcast %46 : vector<128x1xf32> to vector<128x128xf32>
      %48 = vector.extract_strided_slice %14 {offsets = [2, 0], sizes = [1, 128], strides = [1, 1]} : vector<8x128xf32> to vector<1x128xf32>
      %49 = vector.shape_cast %48 : vector<1x128xf32> to vector<1x128xf32>
      %50 = vector.broadcast %49 : vector<1x128xf32> to vector<128x128xf32>
      %c2_i32 = arith.constant 2 : i32
      %51 = arith.addi %8, %c2_i32 : i32
      %52 = arith.index_cast %51 : i32 to index
      %53 = memref.load %arg3[%52] : memref<64xf32, #tpu.memory_space<smem>>
      %54 = arith.addf %47, %50 : vector<128x128xf32>
      %cst_13 = arith.constant 0.000000e+00 : f32
      %55 = vector.broadcast %cst_13 : f32 to vector<128x128xf32>
      %56 = arith.maximumf %54, %55 : vector<128x128xf32>
      %57 = vector.broadcast %53 : f32 to vector<128x128xf32>
      %58 = arith.mulf %57, %56 : vector<128x128xf32>
      %59 = arith.addf %44, %58 : vector<128x128xf32>
      %60 = vector.extract_strided_slice %11 {offsets = [0, 3], sizes = [128, 1], strides = [1, 1]} : vector<128x8xf32> to vector<128x1xf32>
      %61 = vector.shape_cast %60 : vector<128x1xf32> to vector<128x1xf32>
      %62 = vector.broadcast %61 : vector<128x1xf32> to vector<128x128xf32>
      %63 = vector.extract_strided_slice %14 {offsets = [3, 0], sizes = [1, 128], strides = [1, 1]} : vector<8x128xf32> to vector<1x128xf32>
      %64 = vector.shape_cast %63 : vector<1x128xf32> to vector<1x128xf32>
      %65 = vector.broadcast %64 : vector<1x128xf32> to vector<128x128xf32>
      %c3_i32 = arith.constant 3 : i32
      %66 = arith.addi %8, %c3_i32 : i32
      %67 = arith.index_cast %66 : i32 to index
      %68 = memref.load %arg3[%67] : memref<64xf32, #tpu.memory_space<smem>>
      %69 = arith.addf %62, %65 : vector<128x128xf32>
      %cst_14 = arith.constant 0.000000e+00 : f32
      %70 = vector.broadcast %cst_14 : f32 to vector<128x128xf32>
      %71 = arith.maximumf %69, %70 : vector<128x128xf32>
      %72 = vector.broadcast %68 : f32 to vector<128x128xf32>
      %73 = arith.mulf %72, %71 : vector<128x128xf32>
      %74 = arith.addf %59, %73 : vector<128x128xf32>
      %75 = vector.extract_strided_slice %11 {offsets = [0, 4], sizes = [128, 1], strides = [1, 1]} : vector<128x8xf32> to vector<128x1xf32>
      %76 = vector.shape_cast %75 : vector<128x1xf32> to vector<128x1xf32>
      %77 = vector.broadcast %76 : vector<128x1xf32> to vector<128x128xf32>
      %78 = vector.extract_strided_slice %14 {offsets = [4, 0], sizes = [1, 128], strides = [1, 1]} : vector<8x128xf32> to vector<1x128xf32>
      %79 = vector.shape_cast %78 : vector<1x128xf32> to vector<1x128xf32>
      %80 = vector.broadcast %79 : vector<1x128xf32> to vector<128x128xf32>
      %c4_i32 = arith.constant 4 : i32
      %81 = arith.addi %8, %c4_i32 : i32
      %82 = arith.index_cast %81 : i32 to index
      %83 = memref.load %arg3[%82] : memref<64xf32, #tpu.memory_space<smem>>
      %84 = arith.addf %77, %80 : vector<128x128xf32>
      %cst_15 = arith.constant 0.000000e+00 : f32
      %85 = vector.broadcast %cst_15 : f32 to vector<128x128xf32>
      %86 = arith.maximumf %84, %85 : vector<128x128xf32>
      %87 = vector.broadcast %83 : f32 to vector<128x128xf32>
      %88 = arith.mulf %87, %86 : vector<128x128xf32>
      %89 = arith.addf %74, %88 : vector<128x128xf32>
      %90 = vector.extract_strided_slice %11 {offsets = [0, 5], sizes = [128, 1], strides = [1, 1]} : vector<128x8xf32> to vector<128x1xf32>
      %91 = vector.shape_cast %90 : vector<128x1xf32> to vector<128x1xf32>
      %92 = vector.broadcast %91 : vector<128x1xf32> to vector<128x128xf32>
      %93 = vector.extract_strided_slice %14 {offsets = [5, 0], sizes = [1, 128], strides = [1, 1]} : vector<8x128xf32> to vector<1x128xf32>
      %94 = vector.shape_cast %93 : vector<1x128xf32> to vector<1x128xf32>
      %95 = vector.broadcast %94 : vector<1x128xf32> to vector<128x128xf32>
      %c5_i32 = arith.constant 5 : i32
      %96 = arith.addi %8, %c5_i32 : i32
      %97 = arith.index_cast %96 : i32 to index
      %98 = memref.load %arg3[%97] : memref<64xf32, #tpu.memory_space<smem>>
      %99 = arith.addf %92, %95 : vector<128x128xf32>
      %cst_16 = arith.constant 0.000000e+00 : f32
      %100 = vector.broadcast %cst_16 : f32 to vector<128x128xf32>
      %101 = arith.maximumf %99, %100 : vector<128x128xf32>
      %102 = vector.broadcast %98 : f32 to vector<128x128xf32>
      %103 = arith.mulf %102, %101 : vector<128x128xf32>
      %104 = arith.addf %89, %103 : vector<128x128xf32>
      %105 = vector.extract_strided_slice %11 {offsets = [0, 6], sizes = [128, 1], strides = [1, 1]} : vector<128x8xf32> to vector<128x1xf32>
      %106 = vector.shape_cast %105 : vector<128x1xf32> to vector<128x1xf32>
      %107 = vector.broadcast %106 : vector<128x1xf32> to vector<128x128xf32>
      %108 = vector.extract_strided_slice %14 {offsets = [6, 0], sizes = [1, 128], strides = [1, 1]} : vector<8x128xf32> to vector<1x128xf32>
      %109 = vector.shape_cast %108 : vector<1x128xf32> to vector<1x128xf32>
      %110 = vector.broadcast %109 : vector<1x128xf32> to vector<128x128xf32>
      %c6_i32 = arith.constant 6 : i32
      %111 = arith.addi %8, %c6_i32 : i32
      %112 = arith.index_cast %111 : i32 to index
      %113 = memref.load %arg3[%112] : memref<64xf32, #tpu.memory_space<smem>>
      %114 = arith.addf %107, %110 : vector<128x128xf32>
      %cst_17 = arith.constant 0.000000e+00 : f32
      %115 = vector.broadcast %cst_17 : f32 to vector<128x128xf32>
      %116 = arith.maximumf %114, %115 : vector<128x128xf32>
      %117 = vector.broadcast %113 : f32 to vector<128x128xf32>
      %118 = arith.mulf %117, %116 : vector<128x128xf32>
      %119 = arith.addf %104, %118 : vector<128x128xf32>
      %120 = vector.extract_strided_slice %11 {offsets = [0, 7], sizes = [128, 1], strides = [1, 1]} : vector<128x8xf32> to vector<128x1xf32>
      %121 = vector.shape_cast %120 : vector<128x1xf32> to vector<128x1xf32>
      %122 = vector.broadcast %121 : vector<128x1xf32> to vector<128x128xf32>
      %123 = vector.extract_strided_slice %14 {offsets = [7, 0], sizes = [1, 128], strides = [1, 1]} : vector<8x128xf32> to vector<1x128xf32>
      %124 = vector.shape_cast %123 : vector<1x128xf32> to vector<1x128xf32>
      %125 = vector.broadcast %124 : vector<1x128xf32> to vector<128x128xf32>
      %c7_i32 = arith.constant 7 : i32
      %126 = arith.addi %8, %c7_i32 : i32
      %127 = arith.index_cast %126 : i32 to index
      %128 = memref.load %arg3[%127] : memref<64xf32, #tpu.memory_space<smem>>
      %129 = arith.addf %122, %125 : vector<128x128xf32>
      %cst_18 = arith.constant 0.000000e+00 : f32
      %130 = vector.broadcast %cst_18 : f32 to vector<128x128xf32>
      %131 = arith.maximumf %129, %130 : vector<128x128xf32>
      %132 = vector.broadcast %128 : f32 to vector<128x128xf32>
      %133 = arith.mulf %132, %131 : vector<128x128xf32>
      %134 = arith.addf %119, %133 : vector<128x128xf32>
      scf.yield %134 : vector<128x128xf32>
    }
    %c8_i32_0 = arith.constant 8 : i32
    %c0_1 = arith.constant 0 : index
    %c0_2 = arith.constant 0 : index
    %c0_3 = arith.constant 0 : index
    %4 = vector.load %arg7[%c0_1, %c0_2, %c0_3] : memref<1x128x128xf32, #tpu.memory_space<vmem>>, vector<1x128x128xf32>
    %5 = vector.shape_cast %4 : vector<1x128x128xf32> to vector<128x128xf32>
    %6 = vector.shape_cast %3 : vector<128x128xf32> to vector<1x128x128xf32>
    tpu.vector_store %arg7[%c0_1, %c0_2, %c0_3], %6 {strides = array<i32>} : memref<1x128x128xf32, #tpu.memory_space<vmem>>, vector<1x128x128xf32>,
    return
  }
  func.func @transform_0(%arg0: i32, %arg1: i32, %arg2: i32, %arg3: memref<64xf32, #tpu.memory_space<smem>>, %arg4: memref<1xf32, #tpu.memory_space<smem>>) -> (i32, i32, i32, i32) {
    %c0_i32 = arith.constant 0 : i32
    %c0_i32_0 = arith.constant 0 : i32
    %c0_i32_1 = arith.constant 0 : i32
    return %arg0, %c0_i32, %arg1, %c0_i32_0 : i32, i32, i32, i32
  }
  func.func @transform_1(%arg0: i32, %arg1: i32, %arg2: i32, %arg3: memref<64xf32, #tpu.memory_space<smem>>, %arg4: memref<1xf32, #tpu.memory_space<smem>>) -> (i32, i32, i32) {
    %c0_i32 = arith.constant 0 : i32
    %c0_i32_0 = arith.constant 0 : i32
    return %arg0, %c0_i32, %arg2 : i32, i32, i32
  }
  func.func @transform_2(%arg0: i32, %arg1: i32, %arg2: i32, %arg3: memref<64xf32, #tpu.memory_space<smem>>, %arg4: memref<1xf32, #tpu.memory_space<smem>>) -> (i32, i32, i32) {
    %c0_i32 = arith.constant 0 : i32
    return %arg0, %arg1, %arg2 : i32, i32, i32
  }
}

</mosaic_0001>

<bundles_post_ra>
// kernel: tpu_custom_call.1
= control target key start
LH: loop header
LB: loop body
LE: loop exit
PB: predicated region body
PF: predicated region fallthrough
CT: control target
= control target key end

     0   :  { %s3159_s0 = inlined_call_operand.vmem [shape: f32[64], index: 0, kind: input, shape index: {}]   ;;  %s3160_s1 = inlined_call_operand.<no memory space> [shape: f32[1], index: 1, kind: input, shape index: {}]   ;;  %s3161_s2 = inlined_call_operand.vmem [shape: f32[2,8,128,8], index: 2, kind: input, shape index: {}]   ;;  %s3162_s3 = inlined_call_operand.vmem [shape: f32[2,64,128], index: 3, kind: input, shape index: {}]   ;;  %s3163_s4 = inlined_call_operand.hbm [shape: f32[2,128,128], index: 4, kind: output, shape index: {}]  }
   0x1   :  { %s9_s17 = sshll.u32 %s3159_s0, 4  ;;  %13 = sst [smem:[#allocation4]] %s3160_s1  ;;  %s10_s17 = int_to_ptr.vmem [resolvable:$true] %s9_s17 }
   0x2   :  { %s1797_s20 = scalar_lea.vmem %s10_s17, 16  ;;  %p1802_p1 = scmp.lt.s32.totalorder %s10_s17, %s10_s17 }
   0x3   :  { %p1798_p0 = scmp.ne.s32.totalorder %s10_s17, %s1797_s20  ;;  %p1803_p2 = scmp.lt.s32.totalorder %s1797_s20, %s1797_s20 }
   0x5   :  { %p1804_p3 = por %p1803_p2, %p1802_p1 }
   0x7   :  { %p1805_p4 = pnand %p1804_p3, %p1798_p0 }
   0x9   :  { %1808 = shalt.err (!%p1805_p4)  }
   0xa   :  { %s2027_s21 = smov [#allocation3]  }
   0xb   :  { %12 = dma.vmem_to_smem %s10_s17, 16, %s2027_s21, [#allocation2] }
   0xc   :  { %1929 = dma.done.wait [#allocation2], 16 }
   0xd   :  { %1930 = vsyncadd [#allocation2], 4294967280 }
   0xe   :  { %15 = sfence }
   0xf   :  { %16 = vsyncpa [#allocation6], 0 }
  0x10   :  { %18 = vsyncpa [#allocation6 + $0x1], 0  ;;  %s2070_s0 = smov 0   ;;  %s2072_s22 = smov 0  }
  0x11   :  { %s2074_s1 = smov 0   ;;  %s2076_s23 = smov 0  }
  0x12   :  { %s2078_s24 = smov 0   ;;  %s2080_s25 = smov 0  }
  0x13 LB: > { %s1553_s26 = sadd.s32 4294967295, %s1957_s25   ;;  %s1554_s27 = sadd.s32 4294967294, %s1957_s25   ;;  %s1957_s25 = sphi %s2080_s25, %s24_s25   ;;  %s1953_s24 = sphi %s2078_s24, %s3251_s24   ;;  %s1949_s23 = sphi %s2076_s23, %s3250_s23   ;;  %s1945_s1 = sphi %s2074_s1, %s3249_s1   ;;  %s1941_s22 = sphi %s2072_s22, %s3248_s22   ;;  %s1937_s0 = sphi %s2070_s0, %s3247_s0  }
  0x14   : > { %s43_s28 = sadd.s32 1, %s1953_s24  ;;  %s110_s29 = sadd.s32 1, %s1945_s1 }
  0x15   : > { %p45_p5 = scmp.ge.s32.totalorder %s43_s28, 2  ;;  %p120_p6 = scmp.ne.s32.totalorder %s1945_s1, %s1941_s22 }
  0x16   : > { %p121_p7 = scmp.eq.s32.totalorder %s1553_s26, 1  ;;  %p126_p8 = scmp.ne.s32.totalorder %s1941_s22, %s1937_s0 }
  0x17   : > { %s3253_s28 = smov (%p45_p5, %s43_s28), 0  ;;  %p127_p10 = scmp.eq.s32.totalorder %s1554_s27, 1 }
  0x18   : > { %p2110_p9 = por %p121_p7, %p120_p6  ;;  %s103_s5 = ssub.s32 %s1953_s24, %s3253_s28 }
  0x19   : > { %p1557_p11 = scmp.ge.s32.totalorder %s1957_s25, 1  ;;  %p108_p12 = scmp.eq.s32.totalorder %s103_s5, 0 }
  0x1a   : > { %p2117_p13 = por %p127_p10, %p126_p8  ;;  %p169_p0 = scmp.lt.s32.totalorder %s1957_s25, 3 }
  0x1b   : > { %s2123_s7 = scalar_select %p108_p12, %s1945_s1, %s110_s29  }
  0x1c   : > { %p170_p1 = pnand %p1557_p11, %p169_p0 }
  0x1d   : > { %s200_s8 = sand.u32 (!%p170_p1), 1, %s1941_s22   ;;  %p204_p2 = scmp.lt.s32.totalorder (!%p170_p1), %s1949_s23, 1 }
  0x1e   : > { %173 = sbr.rel (%p170_p1) target bundleno = 467 (0x1d3), region = 28  ;;  %s1558_s9 = sshll.u32 (!%p170_p1), %s200_s8, 7 }
  0x1f   : > { %s222_s10 = sld [smem:[#allocation4]] (!%p170_p1)  ;;  %s2140_s20 = scalar_lea.vmem (!%p170_p1), [#allocation5], %s1558_s9 }
  0x20   : > { %s2174_s21 = smov (!%p170_p1), 0  }
  0x25   : > { %s205_s11 = scalar_select %p204_p2, %s1949_s23, 1  ;;  %v223_v0 = vstv %s222_s10  }
  0x26   : > { %v3180_v1 = vmov %v223_v0  ;;  %v3181_v2 = vmov %v223_v0  ;;  %v3182_v3 = vmov %v223_v0  ;;  %v3183_v4 = vmov %v223_v0 }
  0x27   : > { %s1570_s12 = sshll.u32 %s205_s11, 10  ;;  %s1571_s13 = sshll.u32 %s205_s11, 6  ;;  %v3184_v5 = vmov %v223_v0  ;;  %v3185_v6 = vmov %v223_v0  ;;  %v3186_v7 = vmov %v223_v0  ;;  %v3187_v8 = vmov %v223_v0 }
  0x28   : > { %s2133_s16 = scalar_lea.vmem %s3161_s2, %s1570_s12  ;;  %s2138_s19 = scalar_lea.vmem %s3162_s3, %s1571_s13  ;;  %v3188_v9 = vmov %v223_v0  ;;  %v3189_v10 = vmov %v223_v0  ;;  %v3190_v11 = vmov %v223_v0  ;;  %v3191_v12 = vmov %v223_v0 }
  0x29   : > { %v3192_v13 = vmov %v223_v0  ;;  %v3193_v14 = vmov %v223_v0  ;;  %v3194_v15 = vmov %v223_v0 }
  0x2a LB: >> { %3195 = vst [vmem:[#allocation9_spill] sm:$0xff] %v1965_v2  ;;  %3196 = vst [vmem:[#allocation10_spill] sm:$0xff] %v1973_v4  ;;  %v2028_v16 = vmov 0   ;;  %s1564_s26 = sshll.u32 %s2025_s21, 7  ;;  %v2029_v33 = vmov 1   ;;  %v2030_v34 = vmov 2   ;;  %v347_v51 = vlaneseq  ;;  %s2025_s21 = sphi %s2174_s21, %s229_s21   ;;  %v2021_v0 = vphi %v223_v0, %v3246_v0   ;;  %v2017_v15 = vphi %v3194_v15, %v3245_v15   ;;  %v2013_v14 = vphi %v3193_v14, %v3244_v14   ;;  %v2009_v13 = vphi %v3192_v13, %v3243_v13   ;;  %v2005_v12 = vphi %v3191_v12, %v3242_v12   ;;  %v2001_v11 = vphi %v3190_v11, %v3241_v11   ;;  %v1997_v10 = vphi %v3189_v10, %v3240_v10   ;;  %v1993_v9 = vphi %v3188_v9, %v3239_v9   ;;  %v1989_v8 = vphi %v3187_v8, %v3238_v8   ;;  %v1985_v7 = vphi %v3186_v7, %v3237_v7   ;;  %v1981_v6 = vphi %v3185_v6, %v3236_v6   ;;  %v1977_v5 = vphi %v3184_v5, %v3235_v5   ;;  %v1973_v4 = vphi %v3183_v4, %v3234_v4   ;;  %v1969_v3 = vphi %v3182_v3, %v3233_v3   ;;  %v1965_v2 = vphi %v3181_v2, %v3232_v2   ;;  %v1961_v1 = vphi %v3180_v1, %v3231_v1  }
  0x2b   : >> { %3197 = vst [vmem:[#allocation11_spill] sm:$0xff] %v2013_v14  ;;  %3198 = vst [vmem:[#allocation12_spill] sm:$0xff] %v2021_v0  ;;  %1776 = vset.pattern.permute.xlu1 %v2028_v16  ;;  %1775 = vset.pattern.permute.xlu0 %v2028_v16  ;;  %s2229_s27 = scalar_lea.vmem %s2133_s16, %s1564_s26  ;;  %v2031_v35 = vmov 3   ;;  %v2032_v37 = vmov 4   ;;  %s2381_s29 = sshll.u32 %s2025_s21, 3  ;;  %v2033_v54 = vmov 5  }
  0x2c   : >> { %v2232_v17 = vld [vmem:[%s2229_s27 + $0x10] sm:$0xff]  ;;  %v2235_v18 = vld [vmem:[%s2229_s27] sm:$0xff]  ;;  %v2240_v19 = vld [vmem:[%s2229_s27 + $0x18] sm:$0xff]  ;;  %v2383_v55 = vshrl.u32 %v347_v51, 7  ;;  %s2388_s5 = scalar_lea.vmem %s2138_s19, %s2381_s29  ;;  %s351_s9 = sld [smem:[#allocation3 + %s2381_s29]] }
  0x2d   : >> { %279 = vperm.xlu1 %1776, %v2232_v17   ;;  %269 = vperm.xlu0 %1775, %v2235_v18   ;;  %3199 = vst [vmem:[#allocation13_spill] sm:$0xff] %v2240_v19  ;;  %v2243_v20 = vld [vmem:[%s2229_s27 + $0x8] sm:$0xff]  ;;  %v2251_v22 = vld [vmem:[%s2229_s27 + $0x20] sm:$0xff]  ;;  %v2256_v23 = vld [vmem:[%s2229_s27 + $0x38] sm:$0xff]  ;;  %s485_s10 = sadd.s32 1, %s2381_s29  ;;  %s620_s12 = sadd.s32 2, %s2381_s29 }
  0x2e   : >> { %v2248_v21 = vld [vmem:[%s2229_s27 + $0x28] sm:$0xff]  ;;  %3201 = vst [vmem:[#allocation15_spill] sm:$0xff] %v2256_v23  ;;  %v2259_v24 = vld [vmem:[%s2229_s27 + $0x30] sm:$0xff]  ;;  %v2267_v26 = vld [vmem:[%s2229_s27 + $0x40] sm:$0xff]  ;;  %v349_v58 = vsub.s32 0, %v2383_v55  ;;  %s486_s11 = sld [smem:[#allocation3 + %s485_s10]] }
  0x2f   : >> { %3200 = vst [vmem:[#allocation14_spill] sm:$0xff] %v2248_v21  ;;  %v2264_v25 = vld [vmem:[%s2229_s27 + $0x48] sm:$0xff]  ;;  %v2272_v27 = vld [vmem:[%s2229_s27 + $0x58] sm:$0xff]  ;;  %v2275_v28 = vld [vmem:[%s2229_s27 + $0x50] sm:$0xff]  ;;  %s621_s13 = sld [smem:[#allocation3 + %s620_s12]]  ;;  %s755_s14 = sadd.s32 3, %s2381_s29 }
  0x30   : >> { %3202 = vst [vmem:[#allocation16_spill] sm:$0xff] %v2264_v25  ;;  %3203 = vst [vmem:[#allocation17_spill] sm:$0xff] %v2272_v27  ;;  %v2280_v29 = vld [vmem:[%s2229_s27 + $0x68] sm:$0xff]  ;;  %v2283_v30 = vld [vmem:[%s2229_s27 + $0x60] sm:$0xff]  ;;  %s2615_s15 = sld [smem:[#allocation3 + %s755_s14]]  ;;  %s890_s17 = sadd.s32 4, %s2381_s29 }
  0x31   : >> { %284 = vperm.xlu1 %1776, %v2240_v19   ;;  %274 = vperm.xlu0 %1775, %v2243_v20   ;;  %3204 = vst [vmem:[#allocation18_spill] sm:$0xff] %v2280_v29  ;;  %v2288_v31 = vld [vmem:[%s2229_s27 + $0x78] sm:$0xff]  ;;  %v2291_v32 = vld [vmem:[%s2229_s27 + $0x70] sm:$0xff]  ;;  %v2398_v59 = vld [vmem:[%s2388_s5] sm:$0xff]  ;;  %s891_s18 = sld [smem:[#allocation3 + %s890_s17]]  ;;  %s1025_s26 = sadd.s32 5, %s2381_s29 }
  0x32   : >> { %3205 = vst [vmem:[#allocation19_spill] sm:$0xff] %v2288_v31  ;;  %v2407_v62 = vrot.slane %v2398_v59, %v349_v58  ;;  %s229_s21 = sadd.s32 1, %s2025_s21  }
  0x33   : >> { %p3032_p3 = scmp.ge.s32.totalorder %s229_s21, 8  }
  0x34   : >> { %v2444_v2 = vstv %s486_s11  ;;  %s1572_s16 = sshll.u32 (%p3032_p3), %s1949_s23, 11  ;;  %s3113_s14 = scalar_lea.sflag (%p3032_p3), [#allocation6], %s200_s8 }
  0x35   : >> { %294 = vperm.xlu1 %1776, %v2248_v21   ;;  %289 = vperm.xlu0 %1775, %v2251_v22   ;;  %s3106_s12 = scalar_lea.hbm (%p3032_p3), %s3163_s4, %s1572_s16  ;;  %s2036_s23 = smov (%p3032_p3), [#allocation5]  }
  0x36   : > { %s1813_s17 = sshll.u32 (%p3032_p3), %s2036_s23, 4  ;;  %s1814_s17 = int_to_ptr.vmem [resolvable:$false] %s1813_s17 }
  0x39   : >> { %304 = vperm.xlu1 %1776, %v2256_v23   ;;  %299 = vperm.xlu0 %1775, %v2259_v24  }
  0x3d   : >> { %314 = vperm.xlu1 %1776, %v2264_v25   ;;  %309 = vperm.xlu0 %1775, %v2267_v26  }
  0x41   : >> { %324 = vperm.xlu1 %1776, %v2272_v27   ;;  %319 = vperm.xlu0 %1775, %v2275_v28  }
  0x45   : >> { %334 = vperm.xlu1 %1776, %v2280_v29   ;;  %329 = vperm.xlu0 %1775, %v2283_v30  }
  0x49   : >> { %344 = vperm.xlu1 %1776, %v2288_v31   ;;  %339 = vperm.xlu0 %1775, %v2291_v32  }
  0x4d   : >> { %1778 = vset.pattern.permute.xlu1 %v2029_v33  ;;  %1777 = vset.pattern.permute.xlu0 %v2029_v33 }
  0x4e   : >> { %422 = vperm.xlu1 %1778, %v2243_v20   ;;  %418 = vperm.xlu0 %1777, %v2235_v18  }
  0x52   : >> { %426 = vperm.xlu1 %1778, %v2232_v17   ;;  %430 = vperm.xlu0 %1777, %v2240_v19  }
  0x56   : >> { %434 = vperm.xlu1 %1778, %v2251_v22   ;;  %438 = vperm.xlu0 %1777, %v2248_v21  }
  0x5a   : >> { %442 = vperm.xlu1 %1778, %v2259_v24   ;;  %446 = vperm.xlu0 %1777, %v2256_v23  }
  0x5e   : >> { %450 = vperm.xlu1 %1778, %v2267_v26   ;;  %454 = vperm.xlu0 %1777, %v2264_v25  }
  0x62   : >> { %458 = vperm.xlu1 %1778, %v2275_v28   ;;  %462 = vperm.xlu0 %1777, %v2272_v27  }
  0x66   : >> { %466 = vperm.xlu1 %1778, %v2283_v30   ;;  %470 = vperm.xlu0 %1777, %v2280_v29  }
  0x6a   : >> { %474 = vperm.xlu1 %1778, %v2291_v32   ;;  %478 = vperm.xlu0 %1777, %v2288_v31  }
  0x6e   : >> { %1779 = vset.pattern.permute.xlu1 %v2030_v34  ;;  %1780 = vset.pattern.permute.xlu0 %v2030_v34  ;;  %v483_v34 = vsub.s32 1, %v2383_v55 }
  0x6f   : >> { %553 = vperm.xlu1 %1779, %v2235_v18   ;;  %557 = vperm.xlu0 %1780, %v2243_v20  }
  0x70   : >> { %v2430_v14 = vrot.slane %v2398_v59, %v483_v34 }
  0x73   : >> { %561 = vperm.xlu1 %1779, %v2232_v17   ;;  %569 = vperm.xlu0 %1780, %v2251_v22  }
  0x77   : >> { %565 = vperm.xlu1 %1779, %v2240_v19   ;;  %577 = vperm.xlu0 %1780, %v2259_v24  }
  0x7b   : >> { %573 = vperm.xlu1 %1779, %v2248_v21   ;;  %585 = vperm.xlu0 %1780, %v2267_v26  }
  0x7f   : >> { %581 = vperm.xlu1 %1779, %v2256_v23   ;;  %593 = vperm.xlu0 %1780, %v2275_v28  }
  0x83   : >> { %589 = vperm.xlu1 %1779, %v2264_v25   ;;  %601 = vperm.xlu0 %1780, %v2283_v30  }
  0x87   : >> { %597 = vperm.xlu1 %1779, %v2272_v27   ;;  %609 = vperm.xlu0 %1780, %v2291_v32  }
  0x8b   : >> { %605 = vperm.xlu1 %1779, %v2280_v29   ;;  %1781 = vset.pattern.permute.xlu0 %v2031_v35 }
  0x8c   : >> { %688 = vperm.xlu0 %1781, %v2235_v18  }
  0x8f   : >> { %613 = vperm.xlu1 %1779, %v2288_v31  }
  0x90   : >> { %700 = vperm.xlu0 %1781, %v2240_v19  }
  0x93   : >> { %1782 = vset.pattern.permute.xlu1 %v2031_v35  ;;  %v2419_v35 = vstv %s351_s9  ;;  %s1160_s9 = sadd.s32 6, %s2381_s29 }
  0x94   : >> { %692 = vperm.xlu1 %1782, %v2243_v20   ;;  %708 = vperm.xlu0 %1781, %v2248_v21   ;;  %s1161_s10 = sld [smem:[#allocation3 + %s1160_s9]] }
  0x98   : >> { %696 = vperm.xlu1 %1782, %v2232_v17   ;;  %716 = vperm.xlu0 %1781, %v2256_v23  }
  0x9c   : >> { %704 = vperm.xlu1 %1782, %v2251_v22   ;;  %724 = vperm.xlu0 %1781, %v2264_v25  }
  0xa0   : >> { %712 = vperm.xlu1 %1782, %v2259_v24   ;;  %732 = vperm.xlu0 %1781, %v2272_v27  }
  0xa4   : >> { %720 = vperm.xlu1 %1782, %v2267_v26   ;;  %740 = vperm.xlu0 %1781, %v2280_v29  }
  0xa8   : >> { %728 = vperm.xlu1 %1782, %v2275_v28   ;;  %748 = vperm.xlu0 %1781, %v2288_v31  }
  0xac   : >> { %v2341_v36 = vpop.permute.xlu1 %279  ;;  %736 = vperm.xlu1 %1782, %v2283_v30   ;;  %1784 = vset.pattern.permute.xlu0 %v2032_v37  ;;  %v2344_v38 = vpop.permute.xlu0 %269 }
  0xad   : >> { %3206 = vst [vmem:[#allocation20_spill] sm:$0xff] %v2341_v36  ;;  %827 = vperm.xlu0 %1784, %v2243_v20   ;;  %v618_v36 = vsub.s32 2, %v2383_v55 }
  0xb0   : >> { %v2347_v39 = vpop.permute.xlu1 %284  ;;  %744 = vperm.xlu1 %1782, %v2291_v32   ;;  %v2350_v40 = vpop.permute.xlu0 %274 }
  0xb1   : >> { %839 = vperm.xlu0 %1784, %v2251_v22  }
  0xb4   : >> { %v2353_v41 = vpop.permute.xlu1 %294  ;;  %1783 = vset.pattern.permute.xlu1 %v2032_v37  ;;  %v2355_v42 = vpop.permute.xlu0 %289 }
  0xb5   : >> { %823 = vperm.xlu1 %1783, %v2235_v18   ;;  %847 = vperm.xlu0 %1784, %v2259_v24  }
  0xb8   : >> { %v2359_v43 = vpop.permute.xlu1 %304  ;;  %v2361_v44 = vpop.permute.xlu0 %299 }
  0xb9   : >> { %831 = vperm.xlu1 %1783, %v2232_v17   ;;  %855 = vperm.xlu0 %1784, %v2267_v26  }
  0xbc   : >> { %v315_v45 = vpop.permute.xlu1 %314  ;;  %v2365_v46 = vpop.permute.xlu0 %309 }
  0xbd   : >> { %835 = vperm.xlu1 %1783, %v2240_v19   ;;  %863 = vperm.xlu0 %1784, %v2275_v28   ;;  %v361_v63 = vadd.f32 %v2407_v62, %v315_v45 }
  0xbf   : >> { %v377_v37 = vmax.f32 %v361_v63, 0.0 }
  0xc0   : >> { %v325_v47 = vpop.permute.xlu1 %324  ;;  %v2369_v48 = vpop.permute.xlu0 %319 }
  0xc1   : >> { %843 = vperm.xlu1 %1783, %v2248_v21   ;;  %871 = vperm.xlu0 %1784, %v2283_v30   ;;  %v363_v51 = vadd.f32 %v2407_v62, %v325_v47 }
  0xc3   : >> { %v379_v0 = vmax.f32 %v363_v51, 0.0 }
  0xc4   : >> { %v335_v49 = vpop.permute.xlu1 %334  ;;  %v2373_v50 = vpop.permute.xlu0 %329 }
  0xc5   : >> { %851 = vperm.xlu1 %1783, %v2256_v23   ;;  %879 = vperm.xlu0 %1784, %v2291_v32   ;;  %v396_v51 = vmul.f32 %v2419_v35, %v379_v0 }
  0xc8   : >> { %v345_v52 = vpop.permute.xlu1 %344  ;;  %v2377_v53 = vpop.permute.xlu0 %339 }
  0xc9   : >> { %859 = vperm.xlu1 %1783, %v2264_v25   ;;  %1785 = vset.pattern.permute.xlu0 %v2033_v54  ;;  %v367_v4 = vadd.f32 %v2407_v62, %v345_v52  ;;  %v356_v52 = vadd.f32 %v2407_v62, %v2355_v42 }
  0xca   : >> { %958 = vperm.xlu0 %1785, %v2235_v18  }
  0xcd   : >> { %v2390_v56 = vpop.permute.xlu1 %422  ;;  %867 = vperm.xlu1 %1783, %v2272_v27   ;;  %v2393_v57 = vpop.permute.xlu0 %418 }
  0xce   : >> { %3207 = vst [vmem:[#allocation21_spill] sm:$0xff] %v2393_v57  ;;  %970 = vperm.xlu0 %1785, %v2240_v19   ;;  %v2467_v57 = vstv %s621_s13  ;;  %v488_v42 = vadd.f32 %v2430_v14, %v2390_v56  ;;  %v360_v56 = vadd.f32 %v2407_v62, %v2365_v46  ;;  %s1395_s13 = sshll.u32 (%p3032_p3), %s2140_s20, 4  ;;  %s3109_s13 = int_to_ptr.vmem [resolvable:$true] %s1395_s13 }
  0xcf   : > { %p1816_p7 = scmp.lt.s32.totalorder (%p3032_p3), %s3109_s13, %s1814_s17 }
  0xd0   : >> { %v504_v46 = vmax.f32 %v488_v42, 0.0  ;;  %v376_v42 = vmax.f32 %v360_v56, 0.0 }
  0xd1   : >> { %v2401_v60 = vpop.permute.xlu1 %426  ;;  %875 = vperm.xlu1 %1783, %v2280_v29   ;;  %v2404_v61 = vpop.permute.xlu0 %430 }
  0xd2   : >> { %3208 = vst [vmem:[#allocation22_spill] sm:$0xff] %v2401_v60  ;;  %978 = vperm.xlu0 %1785, %v2248_v21   ;;  %v394_v60 = vmul.f32 %v2419_v35, %v377_v37 }
  0xd4   : >> { %v410_v37 = vadd.f32 %v1985_v7, %v394_v60 }
  0xd5   : >> { %v2411_v16 = vpop.permute.xlu1 %434  ;;  %883 = vperm.xlu1 %1783, %v2288_v31   ;;  %v2414_v33 = vpop.permute.xlu0 %438 }
  0xd6   : >> { %986 = vperm.xlu0 %1785, %v2256_v23   ;;  %v365_v23 = vadd.f32 %v2407_v62, %v335_v49 }
  0xd9   : >> { %v2422_v58 = vpop.permute.xlu1 %442  ;;  %1786 = vset.pattern.permute.xlu1 %v2033_v54  ;;  %v2424_v45 = vpop.permute.xlu0 %446 }
  0xda   : >> { %962 = vperm.xlu1 %1786, %v2243_v20   ;;  %994 = vperm.xlu0 %1785, %v2264_v25   ;;  %v355_v25 = vadd.f32 %v2407_v62, %v2347_v39  ;;  %v353_v39 = vadd.f32 %v2407_v62, %v2350_v40 }
  0xdc   : >> { %v371_v0 = vmax.f32 %v355_v25, 0.0 }
  0xdd   : >> { %v2433_v63 = vpop.permute.xlu1 %450  ;;  %v455_v47 = vpop.permute.xlu0 %454 }
  0xde   : >> { %v496_v54 = vadd.f32 %v2430_v14, %v455_v47  ;;  %966 = vperm.xlu1 %1786, %v2232_v17   ;;  %1002 = vperm.xlu0 %1785, %v2272_v27   ;;  %v381_v47 = vmax.f32 %v365_v23, 0.0  ;;  %v357_v23 = vadd.f32 %v2407_v62, %v2353_v41  ;;  %v369_v41 = vmax.f32 %v353_v39, 0.0 }
  0xdf   : >> { %v358_v39 = vadd.f32 %v2407_v62, %v2361_v44 }
  0xe0   : >> { %v512_v34 = vmax.f32 %v496_v54, 0.0  ;;  %v2458_v54 = vrot.slane %v2398_v59, %v618_v36  ;;  %v398_v25 = vmul.f32 %v2419_v35, %v381_v47  ;;  %v386_v44 = vmul.f32 %v2419_v35, %v369_v41 }
  0xe1   : >> { %v2446_v21 = vpop.permute.xlu1 %458  ;;  %v463_v49 = vpop.permute.xlu0 %462  ;;  %v374_v41 = vmax.f32 %v358_v39, 0.0 }
  0xe2   : >> { %v529_v27 = vmul.f32 %v2444_v2, %v512_v34  ;;  %v498_v19 = vadd.f32 %v2430_v14, %v463_v49  ;;  %974 = vperm.xlu1 %1786, %v2251_v22   ;;  %1010 = vperm.xlu0 %1785, %v2280_v29   ;;  %v412_v34 = vadd.f32 %v1977_v5, %v396_v51 }
  0xe3   : >> { %v359_v51 = vadd.f32 %v2407_v62, %v2359_v43  ;;  %v414_v5 = vadd.f32 %v1969_v3, %v398_v25 }
  0xe4   : >> { %v2455_v7 = vadd.f32 %v529_v27, %v410_v37  ;;  %v514_v60 = vmax.f32 %v498_v19, 0.0  ;;  %v383_v27 = vmax.f32 %v367_v4, 0.0  ;;  %v388_v37 = vmul.f32 %v2419_v35, %v371_v0 }
  0xe5   : >> { %v2465_v49 = vpop.permute.xlu1 %466  ;;  %v471_v40 = vpop.permute.xlu0 %470  ;;  %v375_v25 = vmax.f32 %v359_v51, 0.0 }
  0xe6   : >> { %v531_v19 = vmul.f32 %v2444_v2, %v514_v60  ;;  %v500_v36 = vadd.f32 %v2430_v14, %v471_v40  ;;  %982 = vperm.xlu1 %1786, %v2259_v24   ;;  %1018 = vperm.xlu0 %1785, %v2288_v31   ;;  %v373_v60 = vmax.f32 %v357_v23, 0.0  ;;  %v372_v40 = vmax.f32 %v356_v52, 0.0 }
  0xe7   : >> { %v400_v0 = vmul.f32 %v2419_v35, %v383_v27  ;;  %v2495_v23 = vadd.f32 %v2407_v62, %v2344_v38  ;;  %v491_v52 = vadd.f32 %v2430_v14, %v2411_v16  ;;  %v2502_v3 = vadd.f32 %v2009_v13, %v388_v37 }
  0xe8   : >> { %v2480_v4 = vadd.f32 %v531_v19, %v412_v34  ;;  %v516_v47 = vmax.f32 %v500_v36, 0.0  ;;  %v2034_v19 = vmov 6   ;;  %v390_v38 = vmul.f32 %v2419_v35, %v373_v60 }
  0xe9   : >> { %v2486_v29 = vpop.permute.xlu1 %474  ;;  %v479_v31 = vpop.permute.xlu0 %478  ;;  %v389_v36 = vmul.f32 %v2419_v35, %v372_v40  ;;  %v490_v16 = vadd.f32 %v2430_v14, %v2404_v61  ;;  %v493_v13 = vadd.f32 %v2430_v14, %v2422_v58  ;;  %v402_v60 = vadd.f32 %v2017_v15, %v386_v44 }
  0xea   : >> { %v533_v43 = vmul.f32 %v2444_v2, %v516_v47  ;;  %v502_v34 = vadd.f32 %v2430_v14, %v479_v31  ;;  %990 = vperm.xlu1 %1786, %v2267_v26   ;;  %1788 = vset.pattern.permute.xlu0 %v2034_v19  ;;  %v416_v47 = vadd.f32 %v1961_v1, %v400_v0  ;;  %v507_v39 = vmax.f32 %v491_v52, 0.0 }
  0xeb   : >> { %1097 = vperm.xlu0 %1788, %v2243_v20   ;;  %v521_v40 = vmul.f32 %v2444_v2, %v504_v46  ;;  %v392_v56 = vmul.f32 %v2419_v35, %v375_v25  ;;  %v362_v1 = vadd.f32 %v2407_v62, %v2369_v48  ;;  %v492_v58 = vadd.f32 %v2430_v14, %v2414_v33 }
  0xec   : >> { %v2504_v31 = vadd.f32 %v533_v43, %v414_v5  ;;  %v518_v27 = vmax.f32 %v502_v34, 0.0  ;;  %v406_v43 = vadd.f32 %v2001_v11, %v390_v38  ;;  %v391_v15 = vmul.f32 %v2419_v35, %v374_v41 }
  0xed   : >> { %v506_v34 = vmax.f32 %v490_v16, 0.0  ;;  %v405_v46 = vadd.f32 %v2005_v12, %v389_v36  ;;  %v393_v52 = vmul.f32 %v2419_v35, %v376_v42  ;;  %v509_v25 = vmax.f32 %v493_v13, 0.0 }
  0xee   : >> { %v535_v5 = vmul.f32 %v2444_v2, %v518_v27  ;;  %998 = vperm.xlu1 %1786, %v2275_v28   ;;  %v2516_v37 = vpop.permute.xlu1 %553  ;;  %v558_v51 = vpop.permute.xlu0 %557  ;;  %v495_v48 = vadd.f32 %v2430_v14, %v2433_v63  ;;  %v524_v11 = vmul.f32 %v2444_v2, %v507_v39  ;;  %v2542_v12 = vadd.f32 %v1993_v9, %v392_v56 }
  0xef   : >> { %v623_v61 = vadd.f32 %v2458_v54, %v558_v51  ;;  %1109 = vperm.xlu0 %1788, %v2251_v22   ;;  %v378_v36 = vmax.f32 %v362_v1, 0.0  ;;  %v508_v16 = vmax.f32 %v492_v58, 0.0  ;;  %v494_v63 = vadd.f32 %v2430_v14, %v2424_v45 }
  0xf0   : >> { %v2526_v0 = vadd.f32 %v535_v5, %v416_v47  ;;  %v537_v47 = vadd.f32 %v521_v40, %v402_v60  ;;  %v407_v42 = vadd.f32 %v1997_v10, %v391_v15  ;;  %v523_v13 = vmul.f32 %v2444_v2, %v506_v34 }
  0xf1   : >> { %v639_v44 = vmax.f32 %v623_v61, 0.0  ;;  %v409_v60 = vadd.f32 %v1989_v8, %v393_v52  ;;  %v526_v40 = vmul.f32 %v2444_v2, %v509_v25  ;;  %v511_v9 = vmax.f32 %v495_v48, 0.0 }
  0xf2   : >> { %1006 = vperm.xlu1 %1786, %v2283_v30   ;;  %v2536_v33 = vpop.permute.xlu1 %561  ;;  %v570_v27 = vpop.permute.xlu0 %569  ;;  %v497_v39 = vadd.f32 %v2430_v14, %v2446_v21  ;;  %v395_v58 = vmul.f32 %v2419_v35, %v378_v36  ;;  %v364_v8 = vadd.f32 %v2407_v62, %v2373_v50  ;;  %v525_v15 = vmul.f32 %v2444_v2, %v508_v16 }
  0xf3   : >> { %v656_v38 = vmul.f32 %v2467_v57, %v639_v44  ;;  %v626_v41 = vadd.f32 %v2458_v54, %v570_v27  ;;  %1117 = vperm.xlu0 %1788, %v2259_v24   ;;  %v540_v24 = vadd.f32 %v524_v11, %v405_v46  ;;  %v510_v34 = vmax.f32 %v494_v63, 0.0 }
  0xf4   : >> { %v539_v21 = vadd.f32 %v523_v13, %v2502_v3  ;;  %v542_v25 = vadd.f32 %v526_v40, %v407_v42  ;;  %v528_v48 = vmul.f32 %v2444_v2, %v511_v9  ;;  %v513_v27 = vmax.f32 %v497_v39, 0.0 }
  0xf5   : >> { %v2549_v5 = vadd.f32 %v656_v38, %v537_v47  ;;  %v642_v51 = vmax.f32 %v626_v41, 0.0  ;;  %v499_v47 = vadd.f32 %v2430_v14, %v2465_v49  ;;  %v380_v36 = vmax.f32 %v364_v8, 0.0  ;;  %v3209_v8 = vld [vmem:[#allocation21_spill] sm:$0xff] }
  0xf6   : >> { %1014 = vperm.xlu1 %1786, %v2291_v32   ;;  %v566_v45 = vpop.permute.xlu1 %565  ;;  %v578_v61 = vpop.permute.xlu0 %577  ;;  %v366_v16 = vadd.f32 %v2407_v62, %v2377_v53  ;;  %v541_v63 = vadd.f32 %v525_v15, %v406_v43  ;;  %v527_v49 = vmul.f32 %v2444_v2, %v510_v34  ;;  %v544_v40 = vadd.f32 %v528_v48, %v409_v60 }
  0xf7   : >> { %v659_v10 = vmul.f32 %v2467_v57, %v642_v51  ;;  %v625_v56 = vadd.f32 %v2458_v54, %v566_v45  ;;  %v628_v1 = vadd.f32 %v2458_v54, %v578_v61  ;;  %1125 = vperm.xlu0 %1788, %v2267_v26   ;;  %v530_v9 = vmul.f32 %v2444_v2, %v513_v27 }
  0xf8   : >> { %v515_v39 = vmax.f32 %v499_v47, 0.0  ;;  %v501_v45 = vadd.f32 %v2430_v14, %v2486_v29  ;;  %v411_v60 = vadd.f32 %v1981_v6, %v395_v58  ;;  %v487_v29 = vadd.f32 %v2430_v14, %v3209_v8 }
  0xf9   : >> { %v2565_v44 = vadd.f32 %v659_v10, %v540_v24  ;;  %v641_v46 = vmax.f32 %v625_v56, 0.0  ;;  %v644_v52 = vmax.f32 %v628_v1, 0.0  ;;  %v397_v56 = vmul.f32 %v2419_v35, %v380_v36 }
  0xfa   : >> { %1787 = vset.pattern.permute.xlu1 %v2034_v19  ;;  %v574_v50 = vpop.permute.xlu1 %573  ;;  %v586_v11 = vpop.permute.xlu0 %585  ;;  %v382_v1 = vmax.f32 %v366_v16, 0.0  ;;  %v532_v6 = vmul.f32 %v2444_v2, %v515_v39  ;;  %v517_v58 = vmax.f32 %v501_v45, 0.0  ;;  %v622_v36 = vadd.f32 %v2458_v54, %v2516_v37 }
  0xfb   : >> { %v658_v38 = vmul.f32 %v2467_v57, %v641_v46  ;;  %v661_v26 = vmul.f32 %v2467_v57, %v644_v52  ;;  %v627_v3 = vadd.f32 %v2458_v54, %v574_v50  ;;  %v630_v41 = vadd.f32 %v2458_v54, %v586_v11  ;;  %1093 = vperm.xlu1 %1787, %v2235_v18  }
  0xfc   : >> { %1133 = vperm.xlu0 %1788, %v2275_v28   ;;  %v543_v52 = vadd.f32 %v527_v49, %v2542_v12 }
  0xfd   : >> { %v2580_v19 = vadd.f32 %v658_v38, %v539_v21  ;;  %v2582_v42 = vadd.f32 %v661_v26, %v542_v25  ;;  %v643_v13 = vmax.f32 %v627_v3, 0.0  ;;  %v646_v51 = vmax.f32 %v630_v41, 0.0  ;;  %v3210_v38 = vld [vmem:[#allocation13_spill] sm:$0xff]  ;;  %v3211_v3 = vld [vmem:[#allocation10_spill] sm:$0xff] }
  0xfe   : >> { %v582_v61 = vpop.permute.xlu1 %581  ;;  %v594_v53 = vpop.permute.xlu0 %593  ;;  %v546_v25 = vadd.f32 %v530_v9, %v411_v60  ;;  %v368_v26 = vmax.f32 %v2495_v23, 0.0  ;;  %v413_v12 = vadd.f32 %v3211_v3, %v397_v56  ;;  %v399_v41 = vmul.f32 %v2419_v35, %v382_v1 }
  0xff   : >> { %v660_v43 = vmul.f32 %v2467_v57, %v643_v13  ;;  %v663_v28 = vmul.f32 %v2467_v57, %v646_v51  ;;  %v629_v24 = vadd.f32 %v2458_v54, %v582_v61  ;;  %v632_v10 = vadd.f32 %v2458_v54, %v594_v53  ;;  %1101 = vperm.xlu1 %1787, %v2232_v17   ;;  %v3212_v53 = vld [vmem:[#allocation14_spill] sm:$0xff] }
 0x100   : >> { %1141 = vperm.xlu0 %1788, %v2283_v30   ;;  %v503_v51 = vmax.f32 %v487_v29, 0.0  ;;  %v534_v23 = vmul.f32 %v2444_v2, %v517_v58  ;;  %v2035_v60 = vmov 7   ;;  %v3214_v56 = vsub.s32 3, %v2383_v55 }
 0x101   : >> { %v2597_v15 = vadd.f32 %v660_v43, %v541_v63  ;;  %v2599_v34 = vadd.f32 %v663_v28, %v544_v40  ;;  %v645_v21 = vmax.f32 %v629_v24, 0.0  ;;  %v648_v46 = vmax.f32 %v632_v10, 0.0  ;;  %v3213_v28 = vld [vmem:[#allocation9_spill] sm:$0xff] }
 0x102   : >> { %v590_v48 = vpop.permute.xlu1 %589  ;;  %v602_v27 = vpop.permute.xlu0 %601  ;;  %v548_v40 = vadd.f32 %v532_v6, %v413_v12  ;;  %v385_v43 = vmul.f32 %v2419_v35, %v368_v26  ;;  %v415_v24 = vadd.f32 %v3213_v28, %v399_v41  ;;  %v638_v10 = vmax.f32 %v622_v36, 0.0  ;;  %v3218_v12 = vld [vmem:[#allocation22_spill] sm:$0xff] }
 0x103   : >> { %v662_v47 = vmul.f32 %v2467_v57, %v645_v21  ;;  %v665_v50 = vmul.f32 %v2467_v57, %v648_v46  ;;  %v631_v30 = vadd.f32 %v2458_v54, %v590_v48  ;;  %v634_v11 = vadd.f32 %v2458_v54, %v602_v27  ;;  %1105 = vperm.xlu1 %1787, %v3210_v38  }
 0x104   : >> { %1149 = vperm.xlu0 %1788, %v2291_v32   ;;  %v2633_v1 = vrot.slane %v2398_v59, %v3214_v56  ;;  %v520_v6 = vmul.f32 %v2444_v2, %v503_v51  ;;  %v550_v48 = vadd.f32 %v534_v23, %v415_v24  ;;  %v489_v41 = vadd.f32 %v2430_v14, %v3218_v12  ;;  %v3219_v14 = vld [vmem:[#allocation16_spill] sm:$0xff] }
 0x105   : >> { %v2617_v16 = vadd.f32 %v662_v47, %v543_v52  ;;  %v2619_v63 = vadd.f32 %v665_v50, %v546_v25  ;;  %v647_v49 = vmax.f32 %v631_v30, 0.0  ;;  %v650_v13 = vmax.f32 %v634_v11, 0.0  ;;  %v3215_v52 = vld [vmem:[#allocation20_spill] sm:$0xff]  ;;  %v3216_v50 = vld [vmem:[#allocation15_spill] sm:$0xff] }
 0x106   : >> { %v598_v9 = vpop.permute.xlu1 %597  ;;  %v610_v39 = vpop.permute.xlu0 %609  ;;  %v354_v25 = vadd.f32 %v2407_v62, %v3215_v52  ;;  %v3217_v11 = vld [vmem:[#allocation12_spill] sm:$0xff]  ;;  %v2652_v62 = vstv %s2615_s15  ;;  %s1809_s15 = scalar_lea.vmem (%p3032_p3), %s3109_s13, 2048 }
 0x107   : >> { %v664_v45 = vmul.f32 %v2467_v57, %v647_v49  ;;  %v667_v37 = vmul.f32 %v2467_v57, %v650_v13  ;;  %v633_v32 = vadd.f32 %v2458_v54, %v598_v9  ;;  %v636_v61 = vadd.f32 %v2458_v54, %v610_v39  ;;  %1113 = vperm.xlu1 %1787, %v3212_v53   ;;  %p1810_p4 = scmp.ne.s32.totalorder (%p3032_p3), %s3109_s13, %s1809_s15 }
 0x108   : >> { %1789 = vset.pattern.permute.xlu0 %v2035_v60  ;;  %v401_v26 = vadd.f32 %v3217_v11, %v385_v43  ;;  %v370_v9 = vmax.f32 %v354_v25, 0.0  ;;  %v624_v39 = vadd.f32 %v2458_v54, %v2536_v33 }
 0x109   : >> { %v2636_v8 = vadd.f32 %v664_v45, %v2455_v7  ;;  %v2638_v29 = vadd.f32 %v667_v37, %v548_v40  ;;  %v649_v21 = vmax.f32 %v633_v32, 0.0  ;;  %v652_v46 = vmax.f32 %v636_v61, 0.0  ;;  %1228 = vperm.xlu0 %1789, %v2235_v18   ;;  %p1811_p5 = pnand (%p3032_p3), %p1810_p4, %p2110_p9 }
 0x10a   : >> { %v606_v58 = vpop.permute.xlu1 %605  ;;  %v655_v18 = vmul.f32 %v2467_v57, %v638_v10  ;;  %v536_v51 = vadd.f32 %v520_v6, %v401_v26  ;;  %v640_v56 = vmax.f32 %v624_v39, 0.0  ;;  %v3222_v26 = vld [vmem:[#allocation18_spill] sm:$0xff] }
 0x10b   : >> { %v666_v27 = vmul.f32 %v2467_v57, %v649_v21  ;;  %v669_v47 = vmul.f32 %v2467_v57, %v652_v46  ;;  %v635_v7 = vadd.f32 %v2458_v54, %v606_v58  ;;  %1121 = vperm.xlu1 %1787, %v3216_v50   ;;  %v689_v30 = vpop.permute.xlu0 %688  ;;  %v3220_v46 = vld [vmem:[#allocation17_spill] sm:$0xff]  ;;  %p1812_p6 = pneg (%p3032_p3), %p1811_p5 }
 0x10c   : >> { %v757_v3 = vadd.f32 %v2633_v1, %v689_v30  ;;  %v671_v32 = vadd.f32 %v655_v18, %v536_v51  ;;  %v657_v11 = vmul.f32 %v2467_v57, %v640_v56 }
 0x10d   : >> { %v2657_v36 = vadd.f32 %v666_v27, %v2480_v4  ;;  %v2659_v49 = vadd.f32 %v669_v47, %v550_v48  ;;  %v651_v13 = vmax.f32 %v635_v7, 0.0  ;;  %1240 = vperm.xlu0 %1789, %v3210_v38   ;;  %v505_v38 = vmax.f32 %v489_v41, 0.0  ;;  %v3221_v7 = vld [vmem:[#allocation11_spill] sm:$0xff] }
 0x10e   : >> { %v773_v40 = vmax.f32 %v757_v3, 0.0  ;;  %v614_v23 = vpop.permute.xlu1 %613 }
 0x10f   : >> { %v668_v45 = vmul.f32 %v2467_v57, %v651_v13  ;;  %v637_v37 = vadd.f32 %v2458_v54, %v614_v23  ;;  %1129 = vperm.xlu1 %1787, %v3219_v14   ;;  %v701_v4 = vpop.permute.xlu0 %700  ;;  %v387_v54 = vmul.f32 %v2419_v35, %v370_v9  ;;  %v3223_v23 = vld [vmem:[#allocation19_spill] sm:$0xff] }
 0x110   : >> { %v790_v61 = vmul.f32 %v2652_v62, %v773_v40  ;;  %v760_v43 = vadd.f32 %v2633_v1, %v701_v4 }
 0x111   : >> { %v2670_v28 = vadd.f32 %v668_v45, %v2504_v31  ;;  %v653_v24 = vmax.f32 %v637_v37, 0.0  ;;  %1248 = vperm.xlu0 %1789, %v3212_v53   ;;  %v522_v53 = vmul.f32 %v2444_v2, %v505_v38  ;;  %v403_v30 = vadd.f32 %v3221_v7, %v387_v54 }
 0x112   : >> { %v2673_v33 = vadd.f32 %v790_v61, %v671_v32  ;;  %v776_v10 = vmax.f32 %v760_v43, 0.0 }
 0x113   : >> { %v670_v21 = vmul.f32 %v2467_v57, %v653_v24  ;;  %1137 = vperm.xlu1 %1787, %v3220_v46   ;;  %v693_v52 = vpop.permute.xlu1 %692  ;;  %v709_v25 = vpop.permute.xlu0 %708 }
 0x114   : >> { %v793_v6 = vmul.f32 %v2652_v62, %v776_v10  ;;  %v758_v31 = vadd.f32 %v2633_v1, %v693_v52  ;;  %v762_v58 = vadd.f32 %v2633_v1, %v709_v25 }
 0x115   : >> { %v2683_v48 = vadd.f32 %v670_v21, %v2526_v0  ;;  %1256 = vperm.xlu0 %1789, %v3216_v50  }
 0x116   : >> { %v2687_v35 = vadd.f32 %v793_v6, %v2580_v19  ;;  %v774_v27 = vmax.f32 %v758_v31, 0.0  ;;  %v778_v47 = vmax.f32 %v762_v58, 0.0  ;;  %v538_v19 = vadd.f32 %v522_v53, %v403_v30 }
 0x117   : >> { %1145 = vperm.xlu1 %1787, %v3222_v26   ;;  %v697_v18 = vpop.permute.xlu1 %696  ;;  %v717_v3 = vpop.permute.xlu0 %716 }
 0x118   : >> { %v791_v2 = vmul.f32 %v2652_v62, %v774_v27  ;;  %v795_v0 = vmul.f32 %v2652_v62, %v778_v47  ;;  %v759_v12 = vadd.f32 %v2633_v1, %v697_v18  ;;  %v764_v50 = vadd.f32 %v2633_v1, %v717_v3 }
 0x119   : >> { %1264 = vperm.xlu0 %1789, %v3219_v14   ;;  %v673_v40 = vadd.f32 %v657_v11, %v538_v19 }
 0x11a   : >> { %v2698_v41 = vadd.f32 %v791_v2, %v2549_v5  ;;  %v2701_v57 = vadd.f32 %v795_v0, %v2597_v15  ;;  %v775_v13 = vmax.f32 %v759_v12, 0.0  ;;  %v780_v51 = vmax.f32 %v764_v50, 0.0 }
 0x11b   : >> { %1153 = vperm.xlu1 %1787, %v3223_v23   ;;  %v705_v9 = vpop.permute.xlu1 %704  ;;  %v725_v39 = vpop.permute.xlu0 %724 }
 0x11c   : >> { %v792_v45 = vmul.f32 %v2652_v62, %v775_v13  ;;  %v797_v37 = vmul.f32 %v2652_v62, %v780_v51  ;;  %v761_v4 = vadd.f32 %v2633_v1, %v705_v9  ;;  %v766_v14 = vadd.f32 %v2633_v1, %v725_v39 }
 0x11d   : >> { %1272 = vperm.xlu0 %1789, %v3220_v46   ;;  %v2766_v9 = vstv %s891_s18  ;;  %s1815_s18 = scalar_lea.vmem (%p3032_p3), %s1814_s17, 4096 }
 0x11e   : >> { %v2709_v5 = vadd.f32 %v792_v45, %v673_v40  ;;  %v2712_v15 = vadd.f32 %v797_v37, %v2617_v16  ;;  %v777_v32 = vmax.f32 %v761_v4, 0.0  ;;  %v782_v61 = vmax.f32 %v766_v14, 0.0  ;;  %v1792_v14 = vld [vmem:[%s2229_s27 + $0x40] sm:$0xff]  ;;  %p1817_p8 = scmp.lt.s32.totalorder (%p3032_p3), %s1815_s18, %s1809_s15 }
 0x11f   : >> { %1790 = vset.pattern.permute.xlu1 %v2035_v60  ;;  %v713_v43 = vpop.permute.xlu1 %712  ;;  %v733_v38 = vpop.permute.xlu0 %732 }
 0x120   : >> { %v794_v24 = vmul.f32 %v2652_v62, %v777_v32  ;;  %v799_v10 = vmul.f32 %v2652_v62, %v782_v61  ;;  %v763_v54 = vadd.f32 %v2633_v1, %v713_v43  ;;  %v768_v56 = vadd.f32 %v2633_v1, %v733_v38  ;;  %1232 = vperm.xlu1 %1790, %v2243_v20   ;;  %p1818_p10 = por (%p3032_p3), %p1817_p8, %p1816_p7 }
 0x121   : >> { %1280 = vperm.xlu0 %1789, %v3222_v26  }
 0x122   : >> { %v2722_v16 = vadd.f32 %v794_v24, %v2565_v44  ;;  %v2725_v21 = vadd.f32 %v799_v10, %v2636_v8  ;;  %v779_v60 = vmax.f32 %v763_v54, 0.0  ;;  %v784_v46 = vmax.f32 %v768_v56, 0.0  ;;  %v1793_v54 = vld [vmem:[%s2229_s27 + $0x50] sm:$0xff]  ;;  %p1819_p11 = pnand (%p3032_p3), %p1818_p10, %p1812_p6 }
 0x123   : >> { %v721_v52 = vpop.permute.xlu1 %720  ;;  %v741_v25 = vpop.permute.xlu0 %740  ;;  %v888_v44 = vsub.s32 4, %v2383_v55 }
 0x124   : >> { %v796_v6 = vmul.f32 %v2652_v62, %v779_v60  ;;  %v801_v31 = vmul.f32 %v2652_v62, %v784_v46  ;;  %v765_v58 = vadd.f32 %v2633_v1, %v721_v52  ;;  %v770_v20 = vadd.f32 %v2633_v1, %v741_v25  ;;  %1236 = vperm.xlu1 %1790, %v2232_v17  }
 0x125   : >> { %1288 = vperm.xlu0 %1789, %v3223_v23  }
 0x126   : >> { %v2736_v8 = vadd.f32 %v796_v6, %v2582_v42  ;;  %v2739_v53 = vadd.f32 %v801_v31, %v2657_v36  ;;  %v781_v27 = vmax.f32 %v765_v58, 0.0  ;;  %v786_v47 = vmax.f32 %v770_v20, 0.0  ;;  %v1794_v31 = vld [vmem:[%s2229_s27 + $0x60] sm:$0xff] }
 0x127   : >> { %v729_v7 = vpop.permute.xlu1 %728  ;;  %v749_v30 = vpop.permute.xlu0 %748  ;;  %v2747_v42 = vrot.slane %v2398_v59, %v888_v44 }
 0x128   : >> { %v798_v11 = vmul.f32 %v2652_v62, %v781_v27  ;;  %v803_v17 = vmul.f32 %v2652_v62, %v786_v47  ;;  %v767_v26 = vadd.f32 %v2633_v1, %v729_v7  ;;  %v772_v18 = vadd.f32 %v2633_v1, %v749_v30  ;;  %1244 = vperm.xlu1 %1790, %v2251_v22   ;;  %v1791_v22 = vld [vmem:[%s2229_s27 + $0x30] sm:$0xff] }
 0x12a   : >> { %v2750_v36 = vadd.f32 %v798_v11, %v2599_v34  ;;  %v2753_v3 = vadd.f32 %v803_v17, %v2670_v28  ;;  %v783_v2 = vmax.f32 %v767_v26, 0.0  ;;  %v788_v0 = vmax.f32 %v772_v18, 0.0  ;;  %v1795_v11 = vld [vmem:[%s2229_s27 + $0x70] sm:$0xff]  ;;  %s1026_s27 = sld [smem:[#allocation3 + %s1025_s26]] }
 0x12b   : >> { %v737_v12 = vpop.permute.xlu1 %736 }
 0x12c   : >> { %v800_v50 = vmul.f32 %v2652_v62, %v783_v2  ;;  %v805_v19 = vmul.f32 %v2652_v62, %v788_v0  ;;  %v769_v13 = vadd.f32 %v2633_v1, %v737_v12  ;;  %1252 = vperm.xlu1 %1790, %v1791_v22   ;;  %v828_v51 = vpop.permute.xlu0 %827 }
 0x12d   : >> { %v893_v40 = vadd.f32 %v2747_v42, %v828_v51 }
 0x12e   : >> { %v2761_v34 = vadd.f32 %v800_v50, %v2619_v63  ;;  %v2764_v28 = vadd.f32 %v805_v19, %v2683_v48  ;;  %v785_v23 = vmax.f32 %v769_v13, 0.0 }
 0x12f   : >> { %v909_v39 = vmax.f32 %v893_v40, 0.0  ;;  %v745_v45 = vpop.permute.xlu1 %744 }
 0x130   : >> { %v802_v37 = vmul.f32 %v2652_v62, %v785_v23  ;;  %v771_v4 = vadd.f32 %v2633_v1, %v745_v45  ;;  %1260 = vperm.xlu1 %1790, %v1792_v14   ;;  %v840_v32 = vpop.permute.xlu0 %839 }
 0x131   : >> { %v926_v61 = vmul.f32 %v2766_v9, %v909_v39  ;;  %v896_v63 = vadd.f32 %v2747_v42, %v840_v32 }
 0x132   : >> { %v818_v48 = vadd.f32 %v802_v37, %v2638_v29  ;;  %v787_v43 = vmax.f32 %v771_v4, 0.0  ;;  %v1023_v37 = vsub.s32 5, %v2383_v55 }
 0x133   : >> { %v2775_v38 = vadd.f32 %v926_v61, %v2698_v41  ;;  %v912_v24 = vmax.f32 %v896_v63, 0.0 }
 0x134   : >> { %v804_v10 = vmul.f32 %v2652_v62, %v787_v43  ;;  %1268 = vperm.xlu1 %1790, %v1793_v54   ;;  %v824_v1 = vpop.permute.xlu1 %823  ;;  %v848_v46 = vpop.permute.xlu0 %847  ;;  %v2822_v54 = vrot.slane %v2398_v59, %v1023_v37  ;;  %v2833_v59 = vstv %s1026_s27 }
 0x135   : >> { %v929_v56 = vmul.f32 %v2766_v9, %v912_v24  ;;  %v892_v60 = vadd.f32 %v2747_v42, %v824_v1  ;;  %v898_v29 = vadd.f32 %v2747_v42, %v848_v46 }
 0x136   : >> { %v820_v52 = vadd.f32 %v804_v10, %v2659_v49 }
 0x137   : >> { %v2784_v25 = vadd.f32 %v929_v56, %v2722_v16  ;;  %v908_v41 = vmax.f32 %v892_v60, 0.0  ;;  %v914_v6 = vmax.f32 %v898_v29, 0.0 }
 0x138   : >> { %1276 = vperm.xlu1 %1790, %v1794_v31   ;;  %v832_v62 = vpop.permute.xlu1 %831  ;;  %v856_v44 = vpop.permute.xlu0 %855 }
 0x139   : >> { %v925_v58 = vmul.f32 %v2766_v9, %v908_v41  ;;  %v894_v20 = vadd.f32 %v2747_v42, %v832_v62  ;;  %v931_v27 = vmul.f32 %v2766_v9, %v914_v6  ;;  %v900_v49 = vadd.f32 %v2747_v42, %v856_v44 }
 0x13b   : >> { %v941_v47 = vadd.f32 %v925_v58, %v2673_v33  ;;  %v910_v7 = vmax.f32 %v894_v20, 0.0  ;;  %v2793_v16 = vadd.f32 %v931_v27, %v2736_v8  ;;  %v916_v30 = vmax.f32 %v900_v49, 0.0 }
 0x13c   : >> { %1284 = vperm.xlu1 %1790, %v1795_v11   ;;  %v836_v17 = vpop.permute.xlu1 %835  ;;  %v864_v2 = vpop.permute.xlu0 %863 }
 0x13d   : >> { %v927_v26 = vmul.f32 %v2766_v9, %v910_v7  ;;  %v895_v18 = vadd.f32 %v2747_v42, %v836_v17  ;;  %v933_v0 = vmul.f32 %v2766_v9, %v916_v30  ;;  %v902_v12 = vadd.f32 %v2747_v42, %v864_v2 }
 0x13f   : >> { %v2801_v33 = vadd.f32 %v927_v26, %v2709_v5  ;;  %v911_v50 = vmax.f32 %v895_v18, 0.0  ;;  %v2804_v8 = vadd.f32 %v933_v0, %v2750_v36  ;;  %v918_v19 = vmax.f32 %v902_v12, 0.0 }
 0x140   : >> { %v844_v13 = vpop.permute.xlu1 %843  ;;  %v872_v40 = vpop.permute.xlu0 %871 }
 0x141   : >> { %v928_v22 = vmul.f32 %v2766_v9, %v911_v50  ;;  %v897_v51 = vadd.f32 %v2747_v42, %v844_v13  ;;  %v935_v23 = vmul.f32 %v2766_v9, %v918_v19  ;;  %v904_v39 = vadd.f32 %v2747_v42, %v872_v40 }
 0x143   : >> { %v944_v45 = vadd.f32 %v928_v22, %v2687_v35  ;;  %v913_v5 = vmax.f32 %v897_v51, 0.0  ;;  %v2814_v36 = vadd.f32 %v935_v23, %v2761_v34  ;;  %v920_v4 = vmax.f32 %v904_v39, 0.0 }
 0x144   : >> { %v852_v14 = vpop.permute.xlu1 %851  ;;  %v880_v63 = vpop.permute.xlu0 %879 }
 0x145   : >> { %v930_v32 = vmul.f32 %v2766_v9, %v913_v5  ;;  %v899_v61 = vadd.f32 %v2747_v42, %v852_v14  ;;  %v937_v43 = vmul.f32 %v2766_v9, %v920_v4  ;;  %v906_v24 = vadd.f32 %v2747_v42, %v880_v63 }
 0x147   : >> { %v946_v35 = vadd.f32 %v930_v32, %v2701_v57  ;;  %v915_v10 = vmax.f32 %v899_v61, 0.0  ;;  %v2824_v34 = vadd.f32 %v937_v43, %v818_v48  ;;  %v922_v1 = vmax.f32 %v906_v24, 0.0 }
 0x148   : >> { %v860_v56 = vpop.permute.xlu1 %859 }
 0x149   : >> { %v932_v60 = vmul.f32 %v2766_v9, %v915_v10  ;;  %v901_v46 = vadd.f32 %v2747_v42, %v860_v56  ;;  %v939_v29 = vmul.f32 %v2766_v9, %v922_v1  ;;  %v959_v41 = vpop.permute.xlu0 %958 }
 0x14a   : >> { %v1027_v57 = vadd.f32 %v2822_v54, %v959_v41 }
 0x14b   : >> { %v948_v6 = vadd.f32 %v932_v60, %v2712_v15  ;;  %v917_v31 = vmax.f32 %v901_v46, 0.0  ;;  %v2831_v62 = vadd.f32 %v939_v29, %v820_v52 }
 0x14c   : >> { %v868_v48 = vpop.permute.xlu1 %867  ;;  %v1043_v20 = vmax.f32 %v1027_v57, 0.0 }
 0x14d   : >> { %v934_v58 = vmul.f32 %v2766_v9, %v917_v31  ;;  %v903_v44 = vadd.f32 %v2747_v42, %v868_v48  ;;  %v971_v27 = vpop.permute.xlu0 %970 }
 0x14e   : >> { %v1060_v7 = vmul.f32 %v2833_v59, %v1043_v20  ;;  %v1030_v15 = vadd.f32 %v2822_v54, %v971_v27 }
 0x14f   : >> { %v950_v49 = vadd.f32 %v934_v58, %v2725_v21  ;;  %v919_v30 = vmax.f32 %v903_v44, 0.0 }
 0x150   : >> { %v876_v11 = vpop.permute.xlu1 %875  ;;  %v2840_v17 = vadd.f32 %v1060_v7, %v941_v47  ;;  %v1046_v26 = vmax.f32 %v1030_v15, 0.0 }
 0x151   : >> { %v936_v52 = vmul.f32 %v2766_v9, %v919_v30  ;;  %v905_v18 = vadd.f32 %v2747_v42, %v876_v11  ;;  %v979_v2 = vpop.permute.xlu0 %978 }
 0x152   : >> { %v1063_v12 = vmul.f32 %v2833_v59, %v1046_v26  ;;  %v1032_v21 = vadd.f32 %v2822_v54, %v979_v2 }
 0x153   : >> { %v952_v0 = vadd.f32 %v936_v52, %v2739_v53  ;;  %v921_v50 = vmax.f32 %v905_v18, 0.0 }
 0x154   : >> { %v884_v19 = vpop.permute.xlu1 %883  ;;  %v2847_v13 = vadd.f32 %v1063_v12, %v944_v45  ;;  %v1048_v47 = vmax.f32 %v1032_v21, 0.0 }
 0x155   : >> { %v938_v22 = vmul.f32 %v2766_v9, %v921_v50  ;;  %v907_v51 = vadd.f32 %v2747_v42, %v884_v19  ;;  %v987_v40 = vpop.permute.xlu0 %986  ;;  %v2887_v50 = vld [vmem:[%s2388_s5] sm:$0xff]  ;;  %s1295_s5 = sadd.s32 7, %s2381_s29 }
 0x156   : >> { %v1065_v39 = vmul.f32 %v2833_v59, %v1048_v47  ;;  %v1034_v53 = vadd.f32 %v2822_v54, %v987_v40  ;;  %s1296_s11 = sld [smem:[#allocation3 + %s1295_s5]] }
 0x157   : >> { %v954_v23 = vadd.f32 %v938_v22, %v2753_v3  ;;  %v923_v5 = vmax.f32 %v907_v51, 0.0 }
 0x158   : >> { %v2854_v37 = vadd.f32 %v1065_v39, %v946_v35  ;;  %v1050_v14 = vmax.f32 %v1034_v53, 0.0 }
 0x159   : >> { %v940_v4 = vmul.f32 %v2766_v9, %v923_v5  ;;  %v963_v45 = vpop.permute.xlu1 %962  ;;  %v995_v61 = vpop.permute.xlu0 %994 }
 0x15a   : >> { %v1028_v32 = vadd.f32 %v2822_v54, %v963_v45  ;;  %v1067_v42 = vmul.f32 %v2833_v59, %v1050_v14  ;;  %v1036_v3 = vadd.f32 %v2822_v54, %v995_v61  ;;  %v2901_v14 = vstv %s1161_s10 }
 0x15b   : >> { %v956_v63 = vadd.f32 %v940_v4, %v2764_v28 }
 0x15c   : >> { %v1044_v43 = vmax.f32 %v1028_v32, 0.0  ;;  %v2861_v24 = vadd.f32 %v1067_v42, %v948_v6  ;;  %v1052_v10 = vmax.f32 %v1036_v3, 0.0 }
 0x15d   : >> { %v967_v35 = vpop.permute.xlu1 %966  ;;  %v1003_v56 = vpop.permute.xlu0 %1002 }
 0x15e   : >> { %v1061_v1 = vmul.f32 %v2833_v59, %v1044_v43  ;;  %v1029_v9 = vadd.f32 %v2822_v54, %v967_v35  ;;  %v1069_v60 = vmul.f32 %v2833_v59, %v1052_v10  ;;  %v1038_v46 = vadd.f32 %v2822_v54, %v1003_v56 }
 0x160   : >> { %v1077_v28 = vadd.f32 %v1061_v1, %v2775_v38  ;;  %v1045_v29 = vmax.f32 %v1029_v9, 0.0  ;;  %v2868_v41 = vadd.f32 %v1069_v60, %v950_v49  ;;  %v1054_v31 = vmax.f32 %v1038_v46, 0.0 }
 0x161   : >> { %v975_v6 = vpop.permute.xlu1 %974  ;;  %v1011_v58 = vpop.permute.xlu0 %1010  ;;  %v1158_v49 = vsub.s32 6, %v2383_v55 }
 0x162   : >> { %v1062_v57 = vmul.f32 %v2833_v59, %v1045_v29  ;;  %v1031_v48 = vadd.f32 %v2822_v54, %v975_v6  ;;  %v1071_v20 = vmul.f32 %v2833_v59, %v1054_v31  ;;  %v1040_v44 = vadd.f32 %v2822_v54, %v1011_v58 }
 0x164   : >> { %v2876_v27 = vadd.f32 %v1062_v57, %v2801_v33  ;;  %v1047_v38 = vmax.f32 %v1031_v48, 0.0  ;;  %v2879_v7 = vadd.f32 %v1071_v20, %v952_v0  ;;  %v1056_v30 = vmax.f32 %v1040_v44, 0.0 }
 0x165   : >> { %v983_v15 = vpop.permute.xlu1 %982  ;;  %v1019_v26 = vpop.permute.xlu0 %1018  ;;  %v2890_v0 = vrot.slane %v2887_v50, %v1158_v49 }
 0x166   : >> { %v1064_v11 = vmul.f32 %v2833_v59, %v1047_v38  ;;  %v1033_v52 = vadd.f32 %v2822_v54, %v983_v15  ;;  %v1073_v18 = vmul.f32 %v2833_v59, %v1056_v30  ;;  %v1042_v2 = vadd.f32 %v2822_v54, %v1019_v26 }
 0x168   : >> { %v1080_v33 = vadd.f32 %v1064_v11, %v2784_v25  ;;  %v1049_v12 = vmax.f32 %v1033_v52, 0.0  ;;  %v2892_v21 = vadd.f32 %v1073_v18, %v954_v23  ;;  %v1058_v19 = vmax.f32 %v1042_v2, 0.0 }
 0x169   : >> { %v991_v22 = vpop.permute.xlu1 %990 }
 0x16a   : >> { %v1066_v47 = vmul.f32 %v2833_v59, %v1049_v12  ;;  %v1035_v51 = vadd.f32 %v2822_v54, %v991_v22  ;;  %v1075_v40 = vmul.f32 %v2833_v59, %v1058_v19  ;;  %v1098_v39 = vpop.permute.xlu0 %1097 }
 0x16b   : >> { %v1163_v53 = vadd.f32 %v2890_v0, %v1098_v39 }
 0x16c   : >> { %v1082_v5 = vadd.f32 %v1066_v47, %v2793_v16  ;;  %v1051_v25 = vmax.f32 %v1035_v51, 0.0  ;;  %v2899_v4 = vadd.f32 %v1075_v40, %v956_v63 }
 0x16d   : >> { %v999_v23 = vpop.permute.xlu1 %998  ;;  %v1179_v32 = vmax.f32 %v1163_v53, 0.0 }
 0x16e   : >> { %v1068_v45 = vmul.f32 %v2833_v59, %v1051_v25  ;;  %v1037_v61 = vadd.f32 %v2822_v54, %v999_v23  ;;  %v1110_v42 = vpop.permute.xlu0 %1109  ;;  %v1293_v25 = vsub.s32 7, %v2383_v55 }
 0x16f   : >> { %v1196_v43 = vmul.f32 %v2901_v14, %v1179_v32  ;;  %v1166_v16 = vadd.f32 %v2890_v0, %v1110_v42 }
 0x170   : >> { %v1084_v3 = vadd.f32 %v1068_v45, %v2804_v8  ;;  %v1053_v10 = vmax.f32 %v1037_v61, 0.0  ;;  %v2948_v55 = vrot.slane %v2887_v50, %v1293_v25  ;;  %v2959_v50 = vstv %s1296_s11 }
 0x171   : >> { %v1007_v35 = vpop.permute.xlu1 %1006  ;;  %v2908_v1 = vadd.f32 %v1196_v43, %v1077_v28  ;;  %v1182_v9 = vmax.f32 %v1166_v16, 0.0 }
 0x172   : >> { %v1070_v63 = vmul.f32 %v2833_v59, %v1053_v10  ;;  %v1039_v56 = vadd.f32 %v2822_v54, %v1007_v35  ;;  %v1118_v60 = vpop.permute.xlu0 %1117 }
 0x173   : >> { %v1199_v29 = vmul.f32 %v2901_v14, %v1182_v9  ;;  %v1168_v8 = vadd.f32 %v2890_v0, %v1118_v60 }
 0x174   : >> { %v1086_v46 = vadd.f32 %v1070_v63, %v2814_v36  ;;  %v1055_v31 = vmax.f32 %v1039_v56, 0.0 }
 0x175   : >> { %v1015_v6 = vpop.permute.xlu1 %1014  ;;  %v2915_v57 = vadd.f32 %v1199_v29, %v1080_v33  ;;  %v1184_v28 = vmax.f32 %v1168_v8, 0.0 }
 0x176   : >> { %v1072_v48 = vmul.f32 %v2833_v59, %v1055_v31  ;;  %v1041_v58 = vadd.f32 %v2822_v54, %v1015_v6  ;;  %v1126_v20 = vpop.permute.xlu0 %1125 }
 0x177   : >> { %v1201_v38 = vmul.f32 %v2901_v14, %v1184_v28  ;;  %v1170_v36 = vadd.f32 %v2890_v0, %v1126_v20 }
 0x178   : >> { %v1088_v44 = vadd.f32 %v1072_v48, %v2824_v34  ;;  %v1057_v49 = vmax.f32 %v1041_v58, 0.0 }
 0x179   : >> { %v2922_v30 = vadd.f32 %v1201_v38, %v1082_v5  ;;  %v1186_v11 = vmax.f32 %v1170_v36, 0.0 }
 0x17a   : >> { %v1074_v15 = vmul.f32 %v2833_v59, %v1057_v49  ;;  %v1094_v52 = vpop.permute.xlu1 %1093 }
 0x17b   : >> { %v1162_v26 = vadd.f32 %v2890_v0, %v1094_v52  ;;  %v1134_v18 = vpop.permute.xlu0 %1133  ;;  %v1203_v2 = vmul.f32 %v2901_v14, %v1186_v11 }
 0x17c   : >> { %v1090_v54 = vadd.f32 %v1074_v15, %v2831_v62  ;;  %v1172_v34 = vadd.f32 %v2890_v0, %v1134_v18 }
 0x17d   : >> { %v1178_v33 = vmax.f32 %v1162_v26, 0.0  ;;  %v2929_v12 = vadd.f32 %v1203_v2, %v1084_v3 }
 0x17e   : >> { %v1188_v19 = vmax.f32 %v1172_v34, 0.0  ;;  %v1102_v22 = vpop.permute.xlu1 %1101 }
 0x17f   : >> { %v1195_v47 = vmul.f32 %v2901_v14, %v1178_v33  ;;  %v1164_v59 = vadd.f32 %v2890_v0, %v1102_v22  ;;  %v1142_v51 = vpop.permute.xlu0 %1141 }
 0x180   : >> { %v1205_v40 = vmul.f32 %v2901_v14, %v1188_v19  ;;  %v1174_v39 = vadd.f32 %v2890_v0, %v1142_v51 }
 0x181   : >> { %v1211_v62 = vadd.f32 %v1195_v47, %v2840_v17  ;;  %v1180_v5 = vmax.f32 %v1164_v59, 0.0 }
 0x182   : >> { %v2938_v53 = vadd.f32 %v1205_v40, %v1086_v46  ;;  %v1190_v23 = vmax.f32 %v1174_v39, 0.0  ;;  %v1106_v45 = vpop.permute.xlu1 %1105 }
 0x183   : >> { %v1197_v32 = vmul.f32 %v2901_v14, %v1180_v5  ;;  %v1165_v61 = vadd.f32 %v2890_v0, %v1106_v45  ;;  %v1150_v42 = vpop.permute.xlu0 %1149 }
 0x184   : >> { %v1207_v3 = vmul.f32 %v2901_v14, %v1190_v23  ;;  %v1176_v43 = vadd.f32 %v2890_v0, %v1150_v42 }
 0x185   : >> { %v2945_v10 = vadd.f32 %v1197_v32, %v2876_v27  ;;  %v1181_v17 = vmax.f32 %v1165_v61, 0.0 }
 0x186   : >> { %v2950_v16 = vadd.f32 %v1207_v3, %v1088_v44  ;;  %v1192_v35 = vmax.f32 %v1176_v43, 0.0  ;;  %v1114_v63 = vpop.permute.xlu1 %1113 }
 0x187   : >> { %v1198_v9 = vmul.f32 %v2901_v14, %v1181_v17  ;;  %v1167_v56 = vadd.f32 %v2890_v0, %v1114_v63 }
 0x188   : >> { %v1209_v60 = vmul.f32 %v2901_v14, %v1192_v35  ;;  %v1229_v46 = vpop.permute.xlu0 %1228 }
 0x189   : >> { %v1214_v29 = vadd.f32 %v1198_v9, %v2847_v13  ;;  %v1183_v31 = vmax.f32 %v1167_v56, 0.0  ;;  %v1297_v27 = vadd.f32 %v2948_v55, %v1229_v46 }
 0x18a   : >> { %v2957_v8 = vadd.f32 %v1209_v60, %v1090_v54  ;;  %v1122_v6 = vpop.permute.xlu1 %1121 }
 0x18b   : >> { %v1200_v48 = vmul.f32 %v2901_v14, %v1183_v31  ;;  %v1313_v28 = vmax.f32 %v1297_v27, 0.0  ;;  %v1169_v58 = vadd.f32 %v2890_v0, %v1122_v6 }
 0x18c   : >> { %v1241_v20 = vpop.permute.xlu0 %1240 }
 0x18d   : >> { %v1216_v44 = vadd.f32 %v1200_v48, %v2854_v37  ;;  %v1330_v38 = vmul.f32 %v2959_v50, %v1313_v28  ;;  %v1185_v49 = vmax.f32 %v1169_v58, 0.0  ;;  %v1300_v13 = vadd.f32 %v2948_v55, %v1241_v20 }
 0x18e   : >> { %v1130_v36 = vpop.permute.xlu1 %1129 }
 0x18f   : >> { %v2966_v15 = vadd.f32 %v1330_v38, %v1211_v62   ;;  %v1202_v11 = vmul.f32 %v2901_v14, %v1185_v49  ;;  %v1316_v26 = vmax.f32 %v1300_v13, 0.0  ;;  %v1171_v18 = vadd.f32 %v2890_v0, %v1130_v36 }
 0x190   : >> { %v1249_v54 = vpop.permute.xlu0 %1248 }
 0x191   : >> { %v3224_v52 = vmov %v2966_v15  ;;  %v1218_v2 = vadd.f32 %v1202_v11, %v2861_v24  ;;  %v1333_v34 = vmul.f32 %v2959_v50, %v1316_v26  ;;  %v1187_v33 = vmax.f32 %v1171_v18, 0.0 }
 0x192   : >> { %v1302_v37 = vadd.f32 %v2948_v55, %v1249_v54  ;;  %v1138_v19 = vpop.permute.xlu1 %1137  ;;  %1362 = vst [vmem:[%s2140_s20] sm:$0xff] (%p3032_p3), %v3224_v52 }
 0x193   : >> { %v2973_v13 = vadd.f32 %v1333_v34, %v1214_v29   ;;  %v1204_v47 = vmul.f32 %v2901_v14, %v1187_v33  ;;  %v1173_v51 = vadd.f32 %v2890_v0, %v1138_v19 }
 0x194   : >> { %v1318_v59 = vmax.f32 %v1302_v37, 0.0  ;;  %v1257_v40 = vpop.permute.xlu0 %1256 }
 0x195   : >> { %v3225_v22 = vmov %v2973_v13  ;;  %v1220_v39 = vadd.f32 %v1204_v47, %v2868_v41  ;;  %v1189_v5 = vmax.f32 %v1173_v51, 0.0  ;;  %v1304_v24 = vadd.f32 %v2948_v55, %v1257_v40 }
 0x196   : >> { %v1335_v62 = vmul.f32 %v2959_v50, %v1318_v59  ;;  %v1146_v25 = vpop.permute.xlu1 %1145  ;;  %1365 = vst [vmem:[%s2140_s20 + $0x18] sm:$0xff] (%p3032_p3), %v3225_v22 }
 0x197   : >> { %v1206_v45 = vmul.f32 %v2901_v14, %v1189_v5  ;;  %v1320_v32 = vmax.f32 %v1304_v24, 0.0  ;;  %v1175_v61 = vadd.f32 %v2890_v0, %v1146_v25 }
 0x198   : >> { %v2980_v11 = vadd.f32 %v1335_v62, %v1216_v44   ;;  %v1265_v42 = vpop.permute.xlu0 %1264 }
 0x199   : >> { %v1222_v3 = vadd.f32 %v1206_v45, %v2879_v7  ;;  %v1337_v43 = vmul.f32 %v2959_v50, %v1320_v32  ;;  %v1191_v17 = vmax.f32 %v1175_v61, 0.0  ;;  %v1306_v41 = vadd.f32 %v2948_v55, %v1265_v42 }
 0x19a   : >> { %v3226_v23 = vmov %v2980_v11  ;;  %v1154_v35 = vpop.permute.xlu1 %1153 }
 0x19b   : >> { %v2987_v9 = vadd.f32 %v1337_v43, %v1218_v2   ;;  %v1208_v56 = vmul.f32 %v2901_v14, %v1191_v17  ;;  %v1322_v60 = vmax.f32 %v1306_v41, 0.0  ;;  %v1177_v46 = vadd.f32 %v2890_v0, %v1154_v35  ;;  %1367 = vst [vmem:[%s2140_s20 + $0x28] sm:$0xff] (%p3032_p3), %v3226_v23 }
 0x19c   : >> { %v1273_v29 = vpop.permute.xlu0 %1272 }
 0x19d   : >> { %v3227_v63 = vmov %v2987_v9  ;;  %v1224_v31 = vadd.f32 %v1208_v56, %v2892_v21  ;;  %v1339_v27 = vmul.f32 %v2959_v50, %v1322_v60  ;;  %v1193_v6 = vmax.f32 %v1177_v46, 0.0 }
 0x19e   : >> { %v1308_v7 = vadd.f32 %v2948_v55, %v1273_v29  ;;  %1369 = vst [vmem:[%s2140_s20 + $0x38] sm:$0xff] (%p3032_p3), %v3227_v63 }
 0x19f   : >> { %v2994_v48 = vadd.f32 %v1339_v27, %v1220_v39   ;;  %v1210_v28 = vmul.f32 %v2901_v14, %v1193_v6  ;;  %v1233_v20 = vpop.permute.xlu1 %1232 }
 0x1a0   : >> { %v1324_v58 = vmax.f32 %v1308_v7, 0.0  ;;  %v1298_v9 = vadd.f32 %v2948_v55, %v1233_v20  ;;  %v1281_v44 = vpop.permute.xlu0 %1280 }
 0x1a1   : >> { %v1226_v38 = vadd.f32 %v1210_v28, %v2899_v4  ;;  %v1310_v21 = vadd.f32 %v2948_v55, %v1281_v44  ;;  %1371 = vst [vmem:[%s2140_s20 + $0x48] sm:$0xff] (%p3032_p3), %v2994_v48 }
 0x1a2   : >> { %v1341_v0 = vmul.f32 %v2959_v50, %v1324_v58  ;;  %v1314_v49 = vmax.f32 %v1298_v9, 0.0  ;;  %v3239_v9 = vmov %v3227_v63 }
 0x1a3   : >> { %v1326_v13 = vmax.f32 %v1310_v21, 0.0  ;;  %v1237_v15 = vpop.permute.xlu1 %1236 }
 0x1a4   : >> { %v3001_v5 = vadd.f32 %v1341_v0, %v1222_v3   ;;  %v1331_v11 = vmul.f32 %v2959_v50, %v1314_v49  ;;  %v1299_v14 = vadd.f32 %v2948_v55, %v1237_v15  ;;  %v1289_v26 = vpop.permute.xlu0 %1288  ;;  %v3246_v0 = vmov %v3224_v52 }
 0x1a5   : >> { %v1343_v18 = vmul.f32 %v2959_v50, %v1326_v13  ;;  %v1312_v54 = vadd.f32 %v2948_v55, %v1289_v26  ;;  %v3243_v13 = vmov %v3225_v22 }
 0x1a6   : >> { %v3228_v36 = vmov %v3001_v5  ;;  %v1347_v34 = vadd.f32 %v1331_v11, %v2908_v1   ;;  %v1315_v4 = vmax.f32 %v1299_v14, 0.0  ;;  %v3241_v11 = vmov %v3226_v23 }
 0x1a7   : >> { %v3008_v3 = vadd.f32 %v1343_v18, %v1224_v31   ;;  %v1328_v2 = vmax.f32 %v1312_v54, 0.0  ;;  %v1245_v37 = vpop.permute.xlu1 %1244  ;;  %1373 = vst [vmem:[%s2140_s20 + $0x58] sm:$0xff] (%p3032_p3), %v3228_v36 }
 0x1a8   : >> { %v1332_v19 = vmul.f32 %v2959_v50, %v1315_v4  ;;  %v1301_v47 = vadd.f32 %v2948_v55, %v1245_v37  ;;  %v3245_v15 = vmov %v1347_v34  ;;  %1363 = vst [vmem:[%s2140_s20 + $0x8] sm:$0xff] (%p3032_p3), %v1347_v34 }
 0x1a9   : >> { %v3229_v33 = vmov %v3008_v3  ;;  %v1345_v59 = vmul.f32 %v2959_v50, %v1328_v2 }
 0x1aa   : >> { %v1348_v51 = vadd.f32 %v1332_v19, %v2945_v10   ;;  %v1317_v40 = vmax.f32 %v1301_v47, 0.0  ;;  %1375 = vst [vmem:[%s2140_s20 + $0x68] sm:$0xff] (%p3032_p3), %v3229_v33 }
 0x1ab   : >> { %v1361_v39 = vadd.f32 %v1345_v59, %v1226_v38   ;;  %v1253_v62 = vpop.permute.xlu1 %1252 }
 0x1ac   : >> { %v1334_v5 = vmul.f32 %v2959_v50, %v1317_v40  ;;  %v1303_v1 = vadd.f32 %v2948_v55, %v1253_v62  ;;  %v3244_v14 = vmov %v1348_v51  ;;  %1364 = vst [vmem:[%s2140_s20 + $0x10] sm:$0xff] (%p3032_p3), %v1348_v51 }
 0x1ad   : > { %1377 = vst [vmem:[%s2140_s20 + $0x78] sm:$0xff] (%p3032_p3), %v1361_v39 }
 0x1ae   : >> { %v1350_v24 = vadd.f32 %v1334_v5, %v2915_v57   ;;  %v1319_v25 = vmax.f32 %v1303_v1, 0.0  ;;  %v3231_v1 = vmov %v1361_v39  ;;  %v3235_v5 = vmov %v3228_v36 }
 0x1af   : >> { %v1261_v45 = vpop.permute.xlu1 %1260 }
 0x1b0   : >> { %v1336_v32 = vmul.f32 %v2959_v50, %v1319_v25  ;;  %v1305_v61 = vadd.f32 %v2948_v55, %v1261_v45  ;;  %1366 = vst [vmem:[%s2140_s20 + $0x20] sm:$0xff] (%p3032_p3), %v1350_v24 }
 0x1b2   : >> { %v1352_v42 = vadd.f32 %v1336_v32, %v2922_v30   ;;  %v1321_v3 = vmax.f32 %v1305_v61, 0.0 }
 0x1b3   : >> { %v1269_v43 = vpop.permute.xlu1 %1268 }
 0x1b4   : >> { %v1338_v10 = vmul.f32 %v2959_v50, %v1321_v3  ;;  %v1307_v17 = vadd.f32 %v2948_v55, %v1269_v43  ;;  %v3233_v3 = vmov %v3229_v33  ;;  %1368 = vst [vmem:[%s2140_s20 + $0x30] sm:$0xff] (%p3032_p3), %v1352_v42 }
 0x1b6   : >> { %v1354_v41 = vadd.f32 %v1338_v10, %v2929_v12   ;;  %v1323_v35 = vmax.f32 %v1307_v17, 0.0  ;;  %v3240_v10 = vmov %v1352_v42  ;;  %v3242_v12 = vmov %v1350_v24 }
 0x1b7   : >> { %v1277_v56 = vpop.permute.xlu1 %1276 }
 0x1b8   : >> { %v1340_v57 = vmul.f32 %v2959_v50, %v1323_v35  ;;  %v1309_v60 = vadd.f32 %v2948_v55, %v1277_v56  ;;  %1370 = vst [vmem:[%s2140_s20 + $0x40] sm:$0xff] (%p3032_p3), %v1354_v41 }
 0x1ba   : >> { %v1356_v46 = vadd.f32 %v1340_v57, %v2938_v53   ;;  %v1325_v29 = vmax.f32 %v1309_v60, 0.0 }
 0x1bb   : >> { %v1285_v31 = vpop.permute.xlu1 %1284 }
 0x1bc   : >> { %v1342_v30 = vmul.f32 %v2959_v50, %v1325_v29  ;;  %v1311_v27 = vadd.f32 %v2948_v55, %v1285_v31  ;;  %1372 = vst [vmem:[%s2140_s20 + $0x50] sm:$0xff] (%p3032_p3), %v1356_v46 }
 0x1be   : >> { %v1358_v28 = vadd.f32 %v1342_v30, %v2950_v16   ;;  %v1327_v6 = vmax.f32 %v1311_v27, 0.0  ;;  %228 = sbr.rel (!%p3032_p3) target bundleno = 42 (0x2a), region = 75 }
 0x1c0   : >> { %v1344_v7 = vmul.f32 %v2959_v50, %v1327_v6  ;;  %v3234_v4 = vmov %v1358_v28  ;;  %v3236_v6 = vmov %v1356_v46  ;;  %1374 = vst [vmem:[%s2140_s20 + $0x60] sm:$0xff] (%p3032_p3), %v1358_v28 }
 0x1c2   : >> { %v1360_v58 = vadd.f32 %v1344_v7, %v2957_v8   ;;  %v3237_v7 = vmov %v2994_v48  ;;  %v3238_v8 = vmov %v1354_v41 }
 0x1c4   : >> { %v3232_v2 = vmov %v1360_v58  ;;  %1376 = vst [vmem:[%s2140_s20 + $0x70] sm:$0xff] (%p3032_p3), %v1360_v58 }
 0x1c5   : > { %1822 = shalt.err (!%p1819_p11)
}
 0x1c6   : > { %s1823_s8 = scalar_lea.hbm %s3106_s12, 2048  ;;  %s1827_s27 = scalar_lea.hbm %s3163_s4, 4096 }
 0x1c7   : > { %p1824_p12 = scmp.ne.s32.totalorder %s3106_s12, %s1823_s8  ;;  %p1828_p2 = scmp.lt.u32.totalorder %s3106_s12, %s3163_s4 }
 0x1c8   : > { %p1829_p3 = scmp.lt.u32.totalorder %s1827_s27, %s1823_s8  ;;  %p1831_p5 = scmp.lt.u32.totalorder %s1823_s8, %s3106_s12 }
 0x1c9   : > { %p1825_p0 = pnand %p1824_p12, %p2110_p9 }
 0x1ca   : > { %p1830_p4 = por %p1829_p3, %p1828_p2 }
 0x1cb   : > { %p1826_p1 = pneg %p1825_p0 }
 0x1cc   : > { %p1832_p6 = por %p1831_p5, %p1830_p4 }
 0x1ce   : > { %p1833_p7 = pnand %p1832_p6, %p1826_p1 }
 0x1d0   : > { %1836 = shalt.err (!%p1833_p7)
}
 0x1d1   : > { %s2037_s5 = smov 128   ;;  %s2038_s11 = smov 8  }
 0x1d2   : > { %1573 = dma.vmem_to_hbm [thread:$0]  (%p2110_p9), %s3109_s13, 2048, %s3106_s12, %s3113_s14, %s2037_s5, %s2037_s5, %s2038_s11  }
 0x1d3 PF: > { %p1579_p8 = scmp.ge.s32.totalorder %s1957_s25, 2  ;;  %s1410_s29 = sand.u32 1, %s1937_s0  }
 0x1d4   : > { %s1411_s16 = scalar_lea.sflag [#allocation6], %s1410_s29 }
 0x1d5   : > { %p1576_p10 = pnand %p1579_p8, %p2117_p13 }
 0x1d7   : > { %1932 = dma.done.wait (!%p1576_p10), %s1411_s16, 2048  }
 0x1d8   : > { %1934 = vsyncadd (!%p1576_p10), %s1411_s16, 4294965248  ;;  %s24_s25 = sadd.s32 1, %s1957_s25   ;;  %s3247_s0 = smov %s1941_s22 }
 0x1d9   : > { %p21_p11 = scmp.ge.s32.totalorder %s24_s25, 4   ;;  %s3248_s22 = smov %s1945_s1 }
 0x1da   : > { %s3249_s1 = smov %s2123_s7  ;;  %s3250_s23 = smov %s1953_s24 }
 0x1db   : > { %s3251_s24 = smov %s3253_s28  ;;  %23 = sbr.rel (!%p21_p11) target bundleno = 19 (0x13), region = 86 }
 0x1e2   :  { %1416 = vsyncpa [#allocation6], 1 }
 0x1e3   :  { %1418 = vsyncpa [#allocation6 + $0x1], 1 }

</bundles_post_ra>
